<compile_context>
chip_gen: v7x
topology: tpu7x:2x2x1
jax: 0.10.0
libtpu: 0.0.40
codegen_flags: <defaults>
</compile_context>

<pallas_src>
import functools

import jax
import jax.numpy as jnp
from jax.experimental import pallas as pl
from jax.experimental.pallas import tpu as pltpu

LN_EPS = 1e-5  # PyTorch nn.LayerNorm default


def _layernorm(x, g, b):
    mu = jnp.mean(x, axis=-1, keepdims=True)
    var = jnp.mean((x - mu) ** 2, axis=-1, keepdims=True)
    return (x - mu) * jax.lax.rsqrt(var + LN_EPS) * g + b


def _mxu_dot(a, b):
    # bf16 operands, f32 accumulation (MXU-native).
    return jnp.dot(a.astype(jnp.bfloat16), b.astype(jnp.bfloat16),
                   preferred_element_type=jnp.float32)


# ----------------------------------------------------------------------------
# Fused kernel: patch-embed (l==0) + encoder Block (every l) + final LN (last l)
# ----------------------------------------------------------------------------
def fused_kernel(num_heads, d_model,
                 patch_ref, we_ref, pos_ref,
                 ln1g, ln1b, an1g, an1b,
                 wqkv, bqkv, wma, bma,
                 ln2g, ln2b, wm, bm,
                 fing, finb,
                 out_ref, acc_ref):
    l = pl.program_id(1)
    n_layers = pl.num_programs(1)
    bf16 = jnp.bfloat16
    HD = num_heads * d_model

    # --- layer step 0: patch embedding (+ position; conv bias folded into pos)
    @pl.when(l == 0)
    def _():
        emb = _mxu_dot(patch_ref[0], we_ref[...])           # (L, P) @ (P, D)
        acc_ref[...] = emb + pos_ref[...]
    # TODO(synk): dropout(p=0.0) is identity; nonzero-p dropout not implemented.

    x = acc_ref[...]                                        # (L, D) resident

    # --- encoder Block (matches reference: two back-to-back LayerNorms,
    #     scale = d_model**-0.5, Block MLP is a single Linear, no activation)
    out1 = _layernorm(x, ln1g[0], ln1b[0])                  # Block.layernorm1
    xn = _layernorm(out1, an1g[0], an1b[0])                 # Attention.norm1

    # fused q|k|v projection: one (D, 3*HD) MXU matmul
    qkv = _mxu_dot(xn, wqkv[0]) + bqkv[0]                   # (L, 3*HD)
    L = xn.shape[0]
    q3 = jnp.transpose(qkv[:, 0 * HD:1 * HD].reshape(L, num_heads, d_model),
                       (1, 0, 2))                           # (H, L, dh)
    k3 = jnp.transpose(qkv[:, 1 * HD:2 * HD].reshape(L, num_heads, d_model),
                       (1, 0, 2))
    v3 = jnp.transpose(qkv[:, 2 * HD:3 * HD].reshape(L, num_heads, d_model),
                       (1, 0, 2))

    scale = d_model ** (-0.5)
    s = jnp.einsum('hld,hmd->hlm', q3.astype(bf16), k3.astype(bf16),
                   preferred_element_type=jnp.float32) * scale
    s = s - jnp.max(s, axis=-1, keepdims=True)
    p = jnp.exp(s)
    p = p * pl.reciprocal(jnp.sum(p, axis=-1, keepdims=True), approx=True)
    o = jnp.einsum('hlm,hmd->hld', p.astype(bf16), v3.astype(bf16),
                   preferred_element_type=jnp.float32)      # (H, L, dh)
    attn = jnp.transpose(o, (1, 0, 2)).reshape(L, HD)       # heads -> last dim

    atte = _mxu_dot(attn, wma[0]) + bma[0]                  # Attention.mlp
    atte = x + atte                                         # residual 1

    out2 = _layernorm(atte, ln2g[0], ln2b[0])               # Block.layernorm2
    out2 = _mxu_dot(out2, wm[0]) + bm[0]                    # Block.mlp
    y = out2 + atte                                         # residual 2

    acc_ref[...] = y                                        # carry to layer l+1
    is_last = l == n_layers - 1
    out_ref[0] = jnp.where(is_last, _layernorm(y, fing[...], finb[...]), y)


# ----------------------------------------------------------------------------
# Parameter construction (deterministic, synthetic, pre-stacked per layer)
# ----------------------------------------------------------------------------
def init_params(key, image_size, patch_size, in_channels, d_model,
                num_layer, num_heads):
    ph, pw = patch_size
    gh, gw = image_size[0] // ph, image_size[1] // pw
    L = gh * gw
    P = in_channels * ph * pw
    HD = d_model * num_heads

    def keygen(k):
        while True:
            k, sub = jax.random.split(k)
            yield sub

    ki = keygen(key)

    def w(shape, scale=0.02):
        return scale * jax.random.normal(next(ki), shape, dtype=jnp.float32)

    params = {
        # conv weight pre-transposed to (P, D); P = C*ph*pw in PyTorch order.
        "we": w((P, d_model)),
        "be": w((1, d_model)),                       # conv bias
        "pos": jax.random.normal(next(ki), (L, d_model), dtype=jnp.float32),
        "final_g": jnp.ones((1, d_model), jnp.float32),
        "final_b": jnp.zeros((1, d_model), jnp.float32),
        # per-layer weights, stacked along a leading num_layer axis
        "ln1g": jnp.ones((num_layer, 1, d_model), jnp.float32),
        "ln1b": jnp.zeros((num_layer, 1, d_model), jnp.float32),
        "an1g": jnp.ones((num_layer, 1, d_model), jnp.float32),
        "an1b": jnp.zeros((num_layer, 1, d_model), jnp.float32),
        "wqkv": w((num_layer, d_model, 3 * HD)),     # q|k|v fused
        "bqkv": w((num_layer, 1, 3 * HD)),
        "wma": w((num_layer, HD, d_model)),          # Attention.mlp
        "bma": w((num_layer, 1, d_model)),
        "ln2g": jnp.ones((num_layer, 1, d_model), jnp.float32),
        "ln2b": jnp.zeros((num_layer, 1, d_model), jnp.float32),
        "wm": w((num_layer, d_model, d_model)),      # Block.mlp
        "bm": w((num_layer, 1, d_model)),
    }
    return params


# ----------------------------------------------------------------------------
# Forward pass
# ----------------------------------------------------------------------------
def transformer_forward(x, params, *, patch_size, d_model, num_heads):
    B, C, H, W = x.shape
    ph, pw = patch_size
    gh, gw = H // ph, W // pw
    L = gh * gw
    P = C * ph * pw
    HD = d_model * num_heads
    D = d_model
    num_layer = params["wqkv"].shape[0]

    # Non-overlapping patch extraction (== Conv2d with kernel=stride=patch).
    patches = (x.reshape(B, C, gh, ph, gw, pw)
                .transpose(0, 2, 4, 1, 3, 5)
                .reshape(B, L, P))

    # Fold the conv bias into the position table (one fewer DMA + VPU add).
    pos_pb = params["pos"] + params["be"]

    def const_spec(shape):
        nd = len(shape)
        return pl.BlockSpec(shape, lambda b, l, z=(0,) * nd: z)

    def per_layer(shape):
        zeros = (0,) * len(shape)
        return pl.BlockSpec((1,) + shape, lambda b, l, z=zeros: (l,) + z)

    in_specs = [
        pl.BlockSpec((1, L, P), lambda b, l: (b, 0, 0)),  # patches
        const_spec((P, D)),                               # we
        const_spec((L, D)),                               # pos + conv bias
        per_layer((1, D)), per_layer((1, D)),             # Block.layernorm1 g,b
        per_layer((1, D)), per_layer((1, D)),             # Attention.norm1 g,b
        per_layer((D, 3 * HD)), per_layer((1, 3 * HD)),   # fused wqkv, bqkv
        per_layer((HD, D)), per_layer((1, D)),            # Attention.mlp W, b
        per_layer((1, D)), per_layer((1, D)),             # Block.layernorm2 g,b
        per_layer((D, D)), per_layer((1, D)),             # Block.mlp W, b
        const_spec((1, D)), const_spec((1, D)),           # Encoder final LN g,b
    ]

    out = pl.pallas_call(
        functools.partial(fused_kernel, num_heads, d_model),
        out_shape=jax.ShapeDtypeStruct((B, L, D), jnp.float32),
        grid=(B, num_layer),
        in_specs=in_specs,
        out_specs=pl.BlockSpec((1, L, D), lambda b, l: (b, 0, 0)),
        scratch_shapes=[pltpu.VMEM((L, D), jnp.float32)],  # resident activation
        compiler_params=pltpu.CompilerParams(
            dimension_semantics=("parallel", "arbitrary")),
    )(patches, params["we"], pos_pb,
      params["ln1g"], params["ln1b"], params["an1g"], params["an1b"],
      params["wqkv"], params["bqkv"], params["wma"], params["bma"],
      params["ln2g"], params["ln2b"], params["wm"], params["bm"],
      params["final_g"], params["final_b"])
    return out


# ----------------------------------------------------------------------------
if __name__ == "__main__":
    # Small, module-consistent config:
    #   image 16x16, patch 4x4 -> 16 patches; d_model=32, 2 layers, 2 heads.
    B = 2
    in_channels = 4
    image_size = (16, 16)
    patch_size = (4, 4)
    d_model = 32
    num_layer = 2
    num_heads = 2

    key = jax.random.PRNGKey(0)
    kx, kp = jax.random.split(key)
    x = jax.random.normal(
        kx, (B, in_channels, image_size[0], image_size[1]), dtype=jnp.float32)

    params = init_params(kp, image_size, patch_size, in_channels,
                         d_model, num_layer, num_heads)

    out = transformer_forward(x, params, patch_size=patch_size,
                              d_model=d_model, num_heads=num_heads)
    out = jax.block_until_ready(out)
    assert out.shape == (B, 16, d_model), out.shape
    assert bool(jnp.all(jnp.isfinite(out)))
    print("KERNEL_OK")
</pallas_src>

<mosaic_0001>
module attributes {stable_mosaic.version = 11 : i64} {
  func.func @fused_kernel(%arg0: i32, %arg1: i32, %arg2: memref<1x16x64xf32, #tpu.memory_space<vmem>>, %arg3: memref<64x32xf32, #tpu.memory_space<vmem>>, %arg4: memref<16x32xf32, #tpu.memory_space<vmem>>, %arg5: memref<1x1x32xf32, #tpu.memory_space<vmem>>, %arg6: memref<1x1x32xf32, #tpu.memory_space<vmem>>, %arg7: memref<1x1x32xf32, #tpu.memory_space<vmem>>, %arg8: memref<1x1x32xf32, #tpu.memory_space<vmem>>, %arg9: memref<1x32x192xf32, #tpu.memory_space<vmem>>, %arg10: memref<1x1x192xf32, #tpu.memory_space<vmem>>, %arg11: memref<1x64x32xf32, #tpu.memory_space<vmem>>, %arg12: memref<1x1x32xf32, #tpu.memory_space<vmem>>, %arg13: memref<1x1x32xf32, #tpu.memory_space<vmem>>, %arg14: memref<1x1x32xf32, #tpu.memory_space<vmem>>, %arg15: memref<1x32x32xf32, #tpu.memory_space<vmem>>, %arg16: memref<1x1x32xf32, #tpu.memory_space<vmem>>, %arg17: memref<1x32xf32, #tpu.memory_space<vmem>>, %arg18: memref<1x32xf32, #tpu.memory_space<vmem>>, %arg19: memref<1x16x32xf32, #tpu.memory_space<vmem>>, %arg20: memref<16x32xf32, #tpu.memory_space<vmem>>) attributes {dimension_semantics = [#tpu.dimension_semantics<parallel>, #tpu.dimension_semantics<arbitrary>], iteration_bounds = array<i64: 2, 2>, scalar_prefetch = 0 : i64, scratch_operands = 1 : i64, tpu.core_type = #tpu.core_type<tc>, window_params = [{transform_indices = @transform_0, window_bounds = array<i64: 1, 16, 64>}, {pipeline_mode = #tpu.pipeline_mode<synchronous>, transform_indices = @transform_1, window_bounds = array<i64: 64, 32>}, {pipeline_mode = #tpu.pipeline_mode<synchronous>, transform_indices = @transform_2, window_bounds = array<i64: 16, 32>}, {transform_indices = @transform_3, window_bounds = array<i64: 1, 1, 32>}, {transform_indices = @transform_4, window_bounds = array<i64: 1, 1, 32>}, {transform_indices = @transform_5, window_bounds = array<i64: 1, 1, 32>}, {transform_indices = @transform_6, window_bounds = array<i64: 1, 1, 32>}, {transform_indices = @transform_7, window_bounds = array<i64: 1, 32, 192>}, {transform_indices = @transform_8, window_bounds = array<i64: 1, 1, 192>}, {transform_indices = @transform_9, window_bounds = array<i64: 1, 64, 32>}, {transform_indices = @transform_10, window_bounds = array<i64: 1, 1, 32>}, {transform_indices = @transform_11, window_bounds = array<i64: 1, 1, 32>}, {transform_indices = @transform_12, window_bounds = array<i64: 1, 1, 32>}, {transform_indices = @transform_13, window_bounds = array<i64: 1, 32, 32>}, {transform_indices = @transform_14, window_bounds = array<i64: 1, 1, 32>}, {pipeline_mode = #tpu.pipeline_mode<synchronous>, transform_indices = @transform_15, window_bounds = array<i64: 1, 32>}, {pipeline_mode = #tpu.pipeline_mode<synchronous>, transform_indices = @transform_16, window_bounds = array<i64: 1, 32>}, {transform_indices = @transform_17, window_bounds = array<i64: 1, 16, 32>}]} {
    %c0_i32 = arith.constant 0 : i32
    %0 = arith.cmpi eq, %arg1, %c0_i32 : i32
    %1 = arith.extui %0 : i1 to i32
    %c0_i32_0 = arith.constant 0 : i32
    %2 = arith.cmpi ne, %1, %c0_i32_0 : i32
    scf.if %2 {
      %c0_74 = arith.constant 0 : index
      %c0_75 = arith.constant 0 : index
      %c0_76 = arith.constant 0 : index
      %170 = vector.load %arg2[%c0_74, %c0_75, %c0_76] : memref<1x16x64xf32, #tpu.memory_space<vmem>>, vector<1x16x64xf32>
      %171 = vector.shape_cast %170 : vector<1x16x64xf32> to vector<16x64xf32>
      %c0_77 = arith.constant 0 : index
      %c0_78 = arith.constant 0 : index
      %172 = vector.load %arg3[%c0_77, %c0_78] : memref<64x32xf32, #tpu.memory_space<vmem>>, vector<64x32xf32>
      %173 = arith.truncf %171 : vector<16x64xf32> to vector<16x64xbf16>
      %174 = arith.truncf %172 : vector<64x32xf32> to vector<64x32xbf16>
      %cst_79 = arith.constant dense<0.000000e+00> : vector<16x32xf32>
      %175 = tpu.matmul %173, %174, %cst_79 {dimension_numbers = #tpu.dot_dimension_numbers<[1], [0], [0], [1], [0, 0, 1, 1], [], []>} : vector<16x64xbf16>, vector<64x32xbf16>, vector<16x32xf32> -> vector<16x32xf32>
      %c0_80 = arith.constant 0 : index
      %c0_81 = arith.constant 0 : index
      %176 = vector.load %arg4[%c0_80, %c0_81] : memref<16x32xf32, #tpu.memory_space<vmem>>, vector<16x32xf32>
      %177 = arith.addf %175, %176 : vector<16x32xf32>
      %c0_82 = arith.constant 0 : index
      %c0_83 = arith.constant 0 : index
      %178 = vector.load %arg20[%c0_82, %c0_83] : memref<16x32xf32, #tpu.memory_space<vmem>>, vector<16x32xf32>
      tpu.vector_store %arg20[%c0_82, %c0_83], %177 {strides = array<i32>} : memref<16x32xf32, #tpu.memory_space<vmem>>, vector<16x32xf32>,
    } else {
    }
    %c0 = arith.constant 0 : index
    %c0_1 = arith.constant 0 : index
    %3 = vector.load %arg20[%c0, %c0_1] : memref<16x32xf32, #tpu.memory_space<vmem>>, vector<16x32xf32>
    %c0_2 = arith.constant 0 : index
    %c0_3 = arith.constant 0 : index
    %c0_4 = arith.constant 0 : index
    %4 = vector.load %arg5[%c0_2, %c0_3, %c0_4] : memref<1x1x32xf32, #tpu.memory_space<vmem>>, vector<1x1x32xf32>
    %5 = vector.shape_cast %4 : vector<1x1x32xf32> to vector<1x32xf32>
    %c0_5 = arith.constant 0 : index
    %c0_6 = arith.constant 0 : index
    %c0_7 = arith.constant 0 : index
    %6 = vector.load %arg6[%c0_5, %c0_6, %c0_7] : memref<1x1x32xf32, #tpu.memory_space<vmem>>, vector<1x1x32xf32>
    %7 = vector.shape_cast %6 : vector<1x1x32xf32> to vector<1x32xf32>
    %cst = arith.constant dense<0.000000e+00> : vector<16xf32>
    %8 = vector.multi_reduction <add>, %3, %cst [1] : vector<16x32xf32> to vector<16xf32>
    %9 = vector.shape_cast %8 : vector<16xf32> to vector<16x1xf32>
    %cst_8 = arith.constant 3.200000e+01 : f32
    %10 = vector.broadcast %cst_8 : f32 to vector<16x1xf32>
    %11 = arith.divf %9, %10 : vector<16x1xf32>
    %12 = vector.broadcast %11 : vector<16x1xf32> to vector<16x32xf32>
    %13 = arith.subf %3, %12 : vector<16x32xf32>
    %14 = arith.mulf %13, %13 : vector<16x32xf32>
    %cst_9 = arith.constant dense<0.000000e+00> : vector<16xf32>
    %15 = vector.multi_reduction <add>, %14, %cst_9 [1] : vector<16x32xf32> to vector<16xf32>
    %16 = vector.shape_cast %15 : vector<16xf32> to vector<16x1xf32>
    %cst_10 = arith.constant 3.200000e+01 : f32
    %17 = vector.broadcast %cst_10 : f32 to vector<16x1xf32>
    %18 = arith.divf %16, %17 : vector<16x1xf32>
    %19 = vector.broadcast %11 : vector<16x1xf32> to vector<16x32xf32>
    %20 = arith.subf %3, %19 : vector<16x32xf32>
    %cst_11 = arith.constant 9.99999974E-6 : f32
    %21 = vector.broadcast %cst_11 : f32 to vector<16x1xf32>
    %22 = arith.addf %18, %21 : vector<16x1xf32>
    %23 = math.rsqrt %22 : vector<16x1xf32>
    %24 = vector.broadcast %23 : vector<16x1xf32> to vector<16x32xf32>
    %25 = arith.mulf %20, %24 : vector<16x32xf32>
    %26 = vector.broadcast %5 : vector<1x32xf32> to vector<16x32xf32>
    %27 = arith.mulf %25, %26 : vector<16x32xf32>
    %28 = vector.broadcast %7 : vector<1x32xf32> to vector<16x32xf32>
    %29 = arith.addf %27, %28 : vector<16x32xf32>
    %c0_12 = arith.constant 0 : index
    %c0_13 = arith.constant 0 : index
    %c0_14 = arith.constant 0 : index
    %30 = vector.load %arg7[%c0_12, %c0_13, %c0_14] : memref<1x1x32xf32, #tpu.memory_space<vmem>>, vector<1x1x32xf32>
    %31 = vector.shape_cast %30 : vector<1x1x32xf32> to vector<1x32xf32>
    %c0_15 = arith.constant 0 : index
    %c0_16 = arith.constant 0 : index
    %c0_17 = arith.constant 0 : index
    %32 = vector.load %arg8[%c0_15, %c0_16, %c0_17] : memref<1x1x32xf32, #tpu.memory_space<vmem>>, vector<1x1x32xf32>
    %33 = vector.shape_cast %32 : vector<1x1x32xf32> to vector<1x32xf32>
    %cst_18 = arith.constant dense<0.000000e+00> : vector<16xf32>
    %34 = vector.multi_reduction <add>, %29, %cst_18 [1] : vector<16x32xf32> to vector<16xf32>
    %35 = vector.shape_cast %34 : vector<16xf32> to vector<16x1xf32>
    %cst_19 = arith.constant 3.200000e+01 : f32
    %36 = vector.broadcast %cst_19 : f32 to vector<16x1xf32>
    %37 = arith.divf %35, %36 : vector<16x1xf32>
    %38 = vector.broadcast %37 : vector<16x1xf32> to vector<16x32xf32>
    %39 = arith.subf %29, %38 : vector<16x32xf32>
    %40 = arith.mulf %39, %39 : vector<16x32xf32>
    %cst_20 = arith.constant dense<0.000000e+00> : vector<16xf32>
    %41 = vector.multi_reduction <add>, %40, %cst_20 [1] : vector<16x32xf32> to vector<16xf32>
    %42 = vector.shape_cast %41 : vector<16xf32> to vector<16x1xf32>
    %cst_21 = arith.constant 3.200000e+01 : f32
    %43 = vector.broadcast %cst_21 : f32 to vector<16x1xf32>
    %44 = arith.divf %42, %43 : vector<16x1xf32>
    %45 = vector.broadcast %37 : vector<16x1xf32> to vector<16x32xf32>
    %46 = arith.subf %29, %45 : vector<16x32xf32>
    %cst_22 = arith.constant 9.99999974E-6 : f32
    %47 = vector.broadcast %cst_22 : f32 to vector<16x1xf32>
    %48 = arith.addf %44, %47 : vector<16x1xf32>
    %49 = math.rsqrt %48 : vector<16x1xf32>
    %50 = vector.broadcast %49 : vector<16x1xf32> to vector<16x32xf32>
    %51 = arith.mulf %46, %50 : vector<16x32xf32>
    %52 = vector.broadcast %31 : vector<1x32xf32> to vector<16x32xf32>
    %53 = arith.mulf %51, %52 : vector<16x32xf32>
    %54 = vector.broadcast %33 : vector<1x32xf32> to vector<16x32xf32>
    %55 = arith.addf %53, %54 : vector<16x32xf32>
    %c0_23 = arith.constant 0 : index
    %c0_24 = arith.constant 0 : index
    %c0_25 = arith.constant 0 : index
    %56 = vector.load %arg9[%c0_23, %c0_24, %c0_25] : memref<1x32x192xf32, #tpu.memory_space<vmem>>, vector<1x32x192xf32>
    %57 = vector.shape_cast %56 : vector<1x32x192xf32> to vector<32x192xf32>
    %58 = arith.truncf %55 : vector<16x32xf32> to vector<16x32xbf16>
    %59 = arith.truncf %57 : vector<32x192xf32> to vector<32x192xbf16>
    %cst_26 = arith.constant dense<0.000000e+00> : vector<16x192xf32>
    %60 = tpu.matmul %58, %59, %cst_26 {dimension_numbers = #tpu.dot_dimension_numbers<[1], [0], [0], [1], [0, 0, 1, 1], [], []>} : vector<16x32xbf16>, vector<32x192xbf16>, vector<16x192xf32> -> vector<16x192xf32>
    %c0_27 = arith.constant 0 : index
    %c0_28 = arith.constant 0 : index
    %c0_29 = arith.constant 0 : index
    %61 = vector.load %arg10[%c0_27, %c0_28, %c0_29] : memref<1x1x192xf32, #tpu.memory_space<vmem>>, vector<1x1x192xf32>
    %62 = vector.shape_cast %61 : vector<1x1x192xf32> to vector<1x192xf32>
    %63 = vector.broadcast %62 : vector<1x192xf32> to vector<16x192xf32>
    %64 = arith.addf %60, %63 : vector<16x192xf32>
    %65 = vector.extract_strided_slice %64 {offsets = [0, 0], sizes = [16, 64], strides = [1, 1]} : vector<16x192xf32> to vector<16x64xf32>
    %66 = vector.shape_cast %65 : vector<16x64xf32> to vector<16x2x32xf32>
    %67 = tpu.transpose %66, [1, 0, 2] : vector<16x2x32xf32> -> vector<2x16x32xf32>
    %68 = vector.extract_strided_slice %64 {offsets = [0, 64], sizes = [16, 64], strides = [1, 1]} : vector<16x192xf32> to vector<16x64xf32>
    %69 = vector.shape_cast %68 : vector<16x64xf32> to vector<16x2x32xf32>
    %70 = tpu.transpose %69, [1, 0, 2] : vector<16x2x32xf32> -> vector<2x16x32xf32>
    %71 = vector.extract_strided_slice %64 {offsets = [0, 128], sizes = [16, 64], strides = [1, 1]} : vector<16x192xf32> to vector<16x64xf32>
    %72 = vector.shape_cast %71 : vector<16x64xf32> to vector<16x2x32xf32>
    %73 = tpu.transpose %72, [1, 0, 2] : vector<16x2x32xf32> -> vector<2x16x32xf32>
    %74 = arith.truncf %67 : vector<2x16x32xf32> to vector<2x16x32xbf16>
    %75 = arith.truncf %70 : vector<2x16x32xf32> to vector<2x16x32xbf16>
    "tpu.trace_start"() <{level = 10 : i32, message = "hld,hmd->hlm"}> : () -> ()
    %cst_30 = arith.constant dense<0.000000e+00> : vector<2x16x16xf32>
    %76 = tpu.matmul %74, %75, %cst_30 {dimension_numbers = #tpu.dot_dimension_numbers<[2], [2], [1], [1], [0, 0, 0, 1, 1, 1], [0], [0]>} : vector<2x16x32xbf16>, vector<2x16x32xbf16>, vector<2x16x16xf32> -> vector<2x16x16xf32>
    "tpu.trace_stop"() : () -> ()
    %cst_31 = arith.constant 0.176776692 : f32
    %77 = vector.broadcast %cst_31 : f32 to vector<2x16x16xf32>
    %78 = arith.mulf %76, %77 : vector<2x16x16xf32>
    %cst_32 = arith.constant dense<0xFF800000> : vector<2x16xf32>
    %79 = vector.multi_reduction <maximumf>, %78, %cst_32 [2] : vector<2x16x16xf32> to vector<2x16xf32>
    %80 = vector.shape_cast %79 : vector<2x16xf32> to vector<2x16x1xf32>
    %81 = vector.broadcast %80 : vector<2x16x1xf32> to vector<2x16x16xf32>
    %82 = arith.subf %78, %81 : vector<2x16x16xf32>
    %83 = math.exp %82 : vector<2x16x16xf32>
    %cst_33 = arith.constant dense<0.000000e+00> : vector<2x16xf32>
    %84 = vector.multi_reduction <add>, %83, %cst_33 [2] : vector<2x16x16xf32> to vector<2x16xf32>
    %85 = vector.shape_cast %84 : vector<2x16xf32> to vector<2x16x1xf32>
    %86 = tpu.reciprocal %85 {approx = true} : vector<2x16x1xf32> -> vector<2x16x1xf32>
    %87 = vector.broadcast %86 : vector<2x16x1xf32> to vector<2x16x16xf32>
    %88 = arith.mulf %83, %87 : vector<2x16x16xf32>
    %89 = arith.truncf %88 : vector<2x16x16xf32> to vector<2x16x16xbf16>
    %90 = arith.truncf %73 : vector<2x16x32xf32> to vector<2x16x32xbf16>
    "tpu.trace_start"() <{level = 10 : i32, message = "hlm,hmd->hld"}> : () -> ()
    %cst_34 = arith.constant dense<0.000000e+00> : vector<2x16x32xf32>
    %91 = tpu.matmul %89, %90, %cst_34 {dimension_numbers = #tpu.dot_dimension_numbers<[2], [1], [1], [2], [0, 0, 0, 1, 1, 2], [0], [0]>} : vector<2x16x16xbf16>, vector<2x16x32xbf16>, vector<2x16x32xf32> -> vector<2x16x32xf32>
    "tpu.trace_stop"() : () -> ()
    %92 = tpu.transpose %91, [1, 0, 2] : vector<2x16x32xf32> -> vector<16x2x32xf32>
    %93 = vector.shape_cast %92 : vector<16x2x32xf32> to vector<16x64xf32>
    %c0_35 = arith.constant 0 : index
    %c0_36 = arith.constant 0 : index
    %c0_37 = arith.constant 0 : index
    %94 = vector.load %arg11[%c0_35, %c0_36, %c0_37] : memref<1x64x32xf32, #tpu.memory_space<vmem>>, vector<1x64x32xf32>
    %95 = vector.shape_cast %94 : vector<1x64x32xf32> to vector<64x32xf32>
    %96 = arith.truncf %93 : vector<16x64xf32> to vector<16x64xbf16>
    %97 = arith.truncf %95 : vector<64x32xf32> to vector<64x32xbf16>
    %cst_38 = arith.constant dense<0.000000e+00> : vector<16x32xf32>
    %98 = tpu.matmul %96, %97, %cst_38 {dimension_numbers = #tpu.dot_dimension_numbers<[1], [0], [0], [1], [0, 0, 1, 1], [], []>} : vector<16x64xbf16>, vector<64x32xbf16>, vector<16x32xf32> -> vector<16x32xf32>
    %c0_39 = arith.constant 0 : index
    %c0_40 = arith.constant 0 : index
    %c0_41 = arith.constant 0 : index
    %99 = vector.load %arg12[%c0_39, %c0_40, %c0_41] : memref<1x1x32xf32, #tpu.memory_space<vmem>>, vector<1x1x32xf32>
    %100 = vector.shape_cast %99 : vector<1x1x32xf32> to vector<1x32xf32>
    %101 = vector.broadcast %100 : vector<1x32xf32> to vector<16x32xf32>
    %102 = arith.addf %98, %101 : vector<16x32xf32>
    %103 = arith.addf %3, %102 : vector<16x32xf32>
    %c0_42 = arith.constant 0 : index
    %c0_43 = arith.constant 0 : index
    %c0_44 = arith.constant 0 : index
    %104 = vector.load %arg13[%c0_42, %c0_43, %c0_44] : memref<1x1x32xf32, #tpu.memory_space<vmem>>, vector<1x1x32xf32>
    %105 = vector.shape_cast %104 : vector<1x1x32xf32> to vector<1x32xf32>
    %c0_45 = arith.constant 0 : index
    %c0_46 = arith.constant 0 : index
    %c0_47 = arith.constant 0 : index
    %106 = vector.load %arg14[%c0_45, %c0_46, %c0_47] : memref<1x1x32xf32, #tpu.memory_space<vmem>>, vector<1x1x32xf32>
    %107 = vector.shape_cast %106 : vector<1x1x32xf32> to vector<1x32xf32>
    %cst_48 = arith.constant dense<0.000000e+00> : vector<16xf32>
    %108 = vector.multi_reduction <add>, %103, %cst_48 [1] : vector<16x32xf32> to vector<16xf32>
    %109 = vector.shape_cast %108 : vector<16xf32> to vector<16x1xf32>
    %cst_49 = arith.constant 3.200000e+01 : f32
    %110 = vector.broadcast %cst_49 : f32 to vector<16x1xf32>
    %111 = arith.divf %109, %110 : vector<16x1xf32>
    %112 = vector.broadcast %111 : vector<16x1xf32> to vector<16x32xf32>
    %113 = arith.subf %103, %112 : vector<16x32xf32>
    %114 = arith.mulf %113, %113 : vector<16x32xf32>
    %cst_50 = arith.constant dense<0.000000e+00> : vector<16xf32>
    %115 = vector.multi_reduction <add>, %114, %cst_50 [1] : vector<16x32xf32> to vector<16xf32>
    %116 = vector.shape_cast %115 : vector<16xf32> to vector<16x1xf32>
    %cst_51 = arith.constant 3.200000e+01 : f32
    %117 = vector.broadcast %cst_51 : f32 to vector<16x1xf32>
    %118 = arith.divf %116, %117 : vector<16x1xf32>
    %119 = vector.broadcast %111 : vector<16x1xf32> to vector<16x32xf32>
    %120 = arith.subf %103, %119 : vector<16x32xf32>
    %cst_52 = arith.constant 9.99999974E-6 : f32
    %121 = vector.broadcast %cst_52 : f32 to vector<16x1xf32>
    %122 = arith.addf %118, %121 : vector<16x1xf32>
    %123 = math.rsqrt %122 : vector<16x1xf32>
    %124 = vector.broadcast %123 : vector<16x1xf32> to vector<16x32xf32>
    %125 = arith.mulf %120, %124 : vector<16x32xf32>
    %126 = vector.broadcast %105 : vector<1x32xf32> to vector<16x32xf32>
    %127 = arith.mulf %125, %126 : vector<16x32xf32>
    %128 = vector.broadcast %107 : vector<1x32xf32> to vector<16x32xf32>
    %129 = arith.addf %127, %128 : vector<16x32xf32>
    %c0_53 = arith.constant 0 : index
    %c0_54 = arith.constant 0 : index
    %c0_55 = arith.constant 0 : index
    %130 = vector.load %arg15[%c0_53, %c0_54, %c0_55] : memref<1x32x32xf32, #tpu.memory_space<vmem>>, vector<1x32x32xf32>
    %131 = vector.shape_cast %130 : vector<1x32x32xf32> to vector<32x32xf32>
    %132 = arith.truncf %129 : vector<16x32xf32> to vector<16x32xbf16>
    %133 = arith.truncf %131 : vector<32x32xf32> to vector<32x32xbf16>
    %cst_56 = arith.constant dense<0.000000e+00> : vector<16x32xf32>
    %134 = tpu.matmul %132, %133, %cst_56 {dimension_numbers = #tpu.dot_dimension_numbers<[1], [0], [0], [1], [0, 0, 1, 1], [], []>} : vector<16x32xbf16>, vector<32x32xbf16>, vector<16x32xf32> -> vector<16x32xf32>
    %c0_57 = arith.constant 0 : index
    %c0_58 = arith.constant 0 : index
    %c0_59 = arith.constant 0 : index
    %135 = vector.load %arg16[%c0_57, %c0_58, %c0_59] : memref<1x1x32xf32, #tpu.memory_space<vmem>>, vector<1x1x32xf32>
    %136 = vector.shape_cast %135 : vector<1x1x32xf32> to vector<1x32xf32>
    %137 = vector.broadcast %136 : vector<1x32xf32> to vector<16x32xf32>
    %138 = arith.addf %134, %137 : vector<16x32xf32>
    %139 = arith.addf %138, %103 : vector<16x32xf32>
    %c0_60 = arith.constant 0 : index
    %c0_61 = arith.constant 0 : index
    %140 = vector.load %arg20[%c0_60, %c0_61] : memref<16x32xf32, #tpu.memory_space<vmem>>, vector<16x32xf32>
    tpu.vector_store %arg20[%c0_60, %c0_61], %139 {strides = array<i32>} : memref<16x32xf32, #tpu.memory_space<vmem>>, vector<16x32xf32>,
    %c1_i32 = arith.constant 1 : i32
    %141 = arith.cmpi eq, %arg1, %c1_i32 : i32
    %c0_62 = arith.constant 0 : index
    %c0_63 = arith.constant 0 : index
    %142 = vector.load %arg17[%c0_62, %c0_63] : memref<1x32xf32, #tpu.memory_space<vmem>>, vector<1x32xf32>
    %c0_64 = arith.constant 0 : index
    %c0_65 = arith.constant 0 : index
    %143 = vector.load %arg18[%c0_64, %c0_65] : memref<1x32xf32, #tpu.memory_space<vmem>>, vector<1x32xf32>
    %cst_66 = arith.constant dense<0.000000e+00> : vector<16xf32>
    %144 = vector.multi_reduction <add>, %139, %cst_66 [1] : vector<16x32xf32> to vector<16xf32>
    %145 = vector.shape_cast %144 : vector<16xf32> to vector<16x1xf32>
    %cst_67 = arith.constant 3.200000e+01 : f32
    %146 = vector.broadcast %cst_67 : f32 to vector<16x1xf32>
    %147 = arith.divf %145, %146 : vector<16x1xf32>
    %148 = vector.broadcast %147 : vector<16x1xf32> to vector<16x32xf32>
    %149 = arith.subf %139, %148 : vector<16x32xf32>
    %150 = arith.mulf %149, %149 : vector<16x32xf32>
    %cst_68 = arith.constant dense<0.000000e+00> : vector<16xf32>
    %151 = vector.multi_reduction <add>, %150, %cst_68 [1] : vector<16x32xf32> to vector<16xf32>
    %152 = vector.shape_cast %151 : vector<16xf32> to vector<16x1xf32>
    %cst_69 = arith.constant 3.200000e+01 : f32
    %153 = vector.broadcast %cst_69 : f32 to vector<16x1xf32>
    %154 = arith.divf %152, %153 : vector<16x1xf32>
    %155 = vector.broadcast %147 : vector<16x1xf32> to vector<16x32xf32>
    %156 = arith.subf %139, %155 : vector<16x32xf32>
    %cst_70 = arith.constant 9.99999974E-6 : f32
    %157 = vector.broadcast %cst_70 : f32 to vector<16x1xf32>
    %158 = arith.addf %154, %157 : vector<16x1xf32>
    %159 = math.rsqrt %158 : vector<16x1xf32>
    %160 = vector.broadcast %159 : vector<16x1xf32> to vector<16x32xf32>
    %161 = arith.mulf %156, %160 : vector<16x32xf32>
    %162 = vector.broadcast %142 : vector<1x32xf32> to vector<16x32xf32>
    %163 = arith.mulf %161, %162 : vector<16x32xf32>
    %164 = vector.broadcast %143 : vector<1x32xf32> to vector<16x32xf32>
    %165 = arith.addf %163, %164 : vector<16x32xf32>
    %166 = arith.select %141, %165, %139 : vector<16x32xf32>
    %c0_71 = arith.constant 0 : index
    %c0_72 = arith.constant 0 : index
    %c0_73 = arith.constant 0 : index
    %167 = vector.load %arg19[%c0_71, %c0_72, %c0_73] : memref<1x16x32xf32, #tpu.memory_space<vmem>>, vector<1x16x32xf32>
    %168 = vector.shape_cast %167 : vector<1x16x32xf32> to vector<16x32xf32>
    %169 = vector.shape_cast %166 : vector<16x32xf32> to vector<1x16x32xf32>
    tpu.vector_store %arg19[%c0_71, %c0_72, %c0_73], %169 {strides = array<i32>} : memref<1x16x32xf32, #tpu.memory_space<vmem>>, vector<1x16x32xf32>,
    return
  }
  func.func @transform_0(%arg0: i32, %arg1: i32) -> (i32, i32, i32) {
    %c0_i32 = arith.constant 0 : i32
    %c0_i32_0 = arith.constant 0 : i32
    %c0_i32_1 = arith.constant 0 : i32
    return %arg0, %c0_i32, %c0_i32_0 : i32, i32, i32
  }
  func.func @transform_1(%arg0: i32, %arg1: i32) -> (i32, i32) {
    %c0_i32 = arith.constant 0 : i32
    %c0_i32_0 = arith.constant 0 : i32
    %c0_i32_1 = arith.constant 0 : i32
    return %c0_i32, %c0_i32_0 : i32, i32
  }
  func.func @transform_2(%arg0: i32, %arg1: i32) -> (i32, i32) {
    %c0_i32 = arith.constant 0 : i32
    %c0_i32_0 = arith.constant 0 : i32
    %c0_i32_1 = arith.constant 0 : i32
    return %c0_i32, %c0_i32_0 : i32, i32
  }
  func.func @transform_3(%arg0: i32, %arg1: i32) -> (i32, i32, i32) {
    %c0_i32 = arith.constant 0 : i32
    %c0_i32_0 = arith.constant 0 : i32
    %c0_i32_1 = arith.constant 0 : i32
    return %arg1, %c0_i32, %c0_i32_0 : i32, i32, i32
  }
  func.func @transform_4(%arg0: i32, %arg1: i32) -> (i32, i32, i32) {
    %c0_i32 = arith.constant 0 : i32
    %c0_i32_0 = arith.constant 0 : i32
    %c0_i32_1 = arith.constant 0 : i32
    return %arg1, %c0_i32, %c0_i32_0 : i32, i32, i32
  }
  func.func @transform_5(%arg0: i32, %arg1: i32) -> (i32, i32, i32) {
    %c0_i32 = arith.constant 0 : i32
    %c0_i32_0 = arith.constant 0 : i32
    %c0_i32_1 = arith.constant 0 : i32
    return %arg1, %c0_i32, %c0_i32_0 : i32, i32, i32
  }
  func.func @transform_6(%arg0: i32, %arg1: i32) -> (i32, i32, i32) {
    %c0_i32 = arith.constant 0 : i32
    %c0_i32_0 = arith.constant 0 : i32
    %c0_i32_1 = arith.constant 0 : i32
    return %arg1, %c0_i32, %c0_i32_0 : i32, i32, i32
  }
  func.func @transform_7(%arg0: i32, %arg1: i32) -> (i32, i32, i32) {
    %c0_i32 = arith.constant 0 : i32
    %c0_i32_0 = arith.constant 0 : i32
    %c0_i32_1 = arith.constant 0 : i32
    return %arg1, %c0_i32, %c0_i32_0 : i32, i32, i32
  }
  func.func @transform_8(%arg0: i32, %arg1: i32) -> (i32, i32, i32) {
    %c0_i32 = arith.constant 0 : i32
    %c0_i32_0 = arith.constant 0 : i32
    %c0_i32_1 = arith.constant 0 : i32
    return %arg1, %c0_i32, %c0_i32_0 : i32, i32, i32
  }
  func.func @transform_9(%arg0: i32, %arg1: i32) -> (i32, i32, i32) {
    %c0_i32 = arith.constant 0 : i32
    %c0_i32_0 = arith.constant 0 : i32
    %c0_i32_1 = arith.constant 0 : i32
    return %arg1, %c0_i32, %c0_i32_0 : i32, i32, i32
  }
  func.func @transform_10(%arg0: i32, %arg1: i32) -> (i32, i32, i32) {
    %c0_i32 = arith.constant 0 : i32
    %c0_i32_0 = arith.constant 0 : i32
    %c0_i32_1 = arith.constant 0 : i32
    return %arg1, %c0_i32, %c0_i32_0 : i32, i32, i32
  }
  func.func @transform_11(%arg0: i32, %arg1: i32) -> (i32, i32, i32) {
    %c0_i32 = arith.constant 0 : i32
    %c0_i32_0 = arith.constant 0 : i32
    %c0_i32_1 = arith.constant 0 : i32
    return %arg1, %c0_i32, %c0_i32_0 : i32, i32, i32
  }
  func.func @transform_12(%arg0: i32, %arg1: i32) -> (i32, i32, i32) {
    %c0_i32 = arith.constant 0 : i32
    %c0_i32_0 = arith.constant 0 : i32
    %c0_i32_1 = arith.constant 0 : i32
    return %arg1, %c0_i32, %c0_i32_0 : i32, i32, i32
  }
  func.func @transform_13(%arg0: i32, %arg1: i32) -> (i32, i32, i32) {
    %c0_i32 = arith.constant 0 : i32
    %c0_i32_0 = arith.constant 0 : i32
    %c0_i32_1 = arith.constant 0 : i32
    return %arg1, %c0_i32, %c0_i32_0 : i32, i32, i32
  }
  func.func @transform_14(%arg0: i32, %arg1: i32) -> (i32, i32, i32) {
    %c0_i32 = arith.constant 0 : i32
    %c0_i32_0 = arith.constant 0 : i32
    %c0_i32_1 = arith.constant 0 : i32
    return %arg1, %c0_i32, %c0_i32_0 : i32, i32, i32
  }
  func.func @transform_15(%arg0: i32, %arg1: i32) -> (i32, i32) {
    %c0_i32 = arith.constant 0 : i32
    %c0_i32_0 = arith.constant 0 : i32
    %c0_i32_1 = arith.constant 0 : i32
    return %c0_i32, %c0_i32_0 : i32, i32
  }
  func.func @transform_16(%arg0: i32, %arg1: i32) -> (i32, i32) {
    %c0_i32 = arith.constant 0 : i32
    %c0_i32_0 = arith.constant 0 : i32
    %c0_i32_1 = arith.constant 0 : i32
    return %c0_i32, %c0_i32_0 : i32, i32
  }
  func.func @transform_17(%arg0: i32, %arg1: i32) -> (i32, i32, i32) {
    %c0_i32 = arith.constant 0 : i32
    %c0_i32_0 = arith.constant 0 : i32
    %c0_i32_1 = arith.constant 0 : i32
    return %arg0, %c0_i32, %c0_i32_0 : i32, i32, i32
  }
}

</mosaic_0001>

<bundles_post_ra>
// kernel: tpu_custom_call.1
= control target key start
LH: loop header
LB: loop body
LE: loop exit
PB: predicated region body
PF: predicated region fallthrough
CT: control target
= control target key end

     0   :  { %s3624_s0 = inlined_call_operand.vmem [shape: f32[2,16,64], index: 0, kind: input, shape index: {}]   ;;  %s3625_s1 = inlined_call_operand.vmem [shape: f32[64,32], index: 1, kind: input, shape index: {}]   ;;  %s3626_s2 = inlined_call_operand.vmem [shape: f32[16,32], index: 2, kind: input, shape index: {}]   ;;  %s3627_s3 = inlined_call_operand.vmem [shape: f32[2,1,32], index: 3, kind: input, shape index: {}]   ;;  %s3628_s4 = inlined_call_operand.vmem [shape: f32[2,1,32], index: 4, kind: input, shape index: {}]   ;;  %s3629_s5 = inlined_call_operand.vmem [shape: f32[2,1,32], index: 5, kind: input, shape index: {}]   ;;  %s3630_s6 = inlined_call_operand.vmem [shape: f32[2,1,32], index: 6, kind: input, shape index: {}]   ;;  %s3631_s7 = inlined_call_operand.vmem [shape: f32[2,32,192], index: 7, kind: input, shape index: {}]   ;;  %s3632_s8 = inlined_call_operand.vmem [shape: f32[2,1,192], index: 8, kind: input, shape index: {}]   ;;  %s3633_s9 = inlined_call_operand.vmem [shape: f32[2,64,32], index: 9, kind: input, shape index: {}]   ;;  %s3634_s10 = inlined_call_operand.vmem [shape: f32[2,1,32], index: 10, kind: input, shape index: {}]   ;;  %s3635_s11 = inlined_call_operand.vmem [shape: f32[2,1,32], index: 11, kind: input, shape index: {}]   ;;  %s3636_s12 = inlined_call_operand.vmem [shape: f32[2,1,32], index: 12, kind: input, shape index: {}]   ;;  %s3637_s13 = inlined_call_operand.vmem [shape: f32[2,32,32], index: 13, kind: input, shape index: {}]   ;;  %s3638_s14 = inlined_call_operand.vmem [shape: f32[2,1,32], index: 14, kind: input, shape index: {}]   ;;  %s3639_s15 = inlined_call_operand.vmem [shape: f32[1,32], index: 15, kind: input, shape index: {}]   ;;  %s3640_s16 = inlined_call_operand.vmem [shape: f32[1,32], index: 16, kind: input, shape index: {}]   ;;  %s3641_s17 = inlined_call_operand.hbm [shape: f32[2,16,32], index: 17, kind: output, shape index: {}]  }
   0x1   :  { %3659 = sst [smem:[#allocation19_spill]] %s3624_s0 }
   0x2   :  { %3660 = sst [smem:[#allocation20_spill]] %s3625_s1 }
   0x3   :  { %3661 = sst [smem:[#allocation21_spill]] %s3626_s2 }
   0x4   :  { %3662 = sst [smem:[#allocation22_spill]] %s3630_s6 }
   0x5   :  { %3663 = sst [smem:[#allocation23_spill]] %s3631_s7 }
   0x6   :  { %3664 = sst [smem:[#allocation24_spill]] %s3632_s8 }
   0x7   :  { %3665 = sst [smem:[#allocation25_spill]] %s3639_s15 }
   0x8   :  { %3666 = sst [smem:[#allocation26_spill]] %s3640_s16 }
   0x9   :  { %3667 = sst [smem:[#allocation27_spill]] %s3641_s17 }
   0xa   :  { %22 = vsyncpa [#allocation4], 0 }
   0xb   :  { %24 = vsyncpa [#allocation4 + $0x1], 0  ;;  %s3074_s24 = smov 0   ;;  %s3076_s25 = smov 0  }
   0xc   :  { %s3078_s26 = smov 0   ;;  %s3080_s27 = smov 0  }
   0xd   :  { %s3082_s28 = smov 0   ;;  %s3084_s29 = smov 0  }
   0xe   :  { %s3086_s0 = smov 0   ;;  %s3088_s30 = smov 0  }
   0xf LB: > { %3668 = sst [smem:[#allocation6_spill]] %s2941_s24  ;;  %s2618_s18 = sadd.s32 4294967295, %s2969_s30   ;;  %s2969_s30 = sphi %s3088_s30, %s30_s30   ;;  %s2965_s0 = sphi %s3086_s0, %s3713_s0   ;;  %s2961_s29 = sphi %s3084_s29, %s3712_s29   ;;  %s2957_s28 = sphi %s3082_s28, %s3711_s28   ;;  %s2953_s27 = sphi %s3080_s27, %s3710_s27   ;;  %s2949_s26 = sphi %s3078_s26, %s3709_s26   ;;  %s2945_s25 = sphi %s3076_s25, %s3708_s25   ;;  %s2941_s24 = sphi %s3074_s24, %s3707_s24  }
  0x10   : > { %3669 = sst [smem:[#allocation7_spill]] %s2945_s25  ;;  %s2619_s19 = sadd.s32 4294967294, %s2969_s30  }
  0x11   : > { %3670 = sst [smem:[#allocation8_spill]] %s2949_s26  ;;  %s39_s1 = sadd.s32 1, %s2961_s29 }
  0x12   : > { %3671 = sst [smem:[#allocation9_spill]] %s2953_s27  ;;  %p40_p0 = scmp.ge.s32.totalorder %s39_s1, 2 }
  0x13   : > { %3672 = sst [smem:[#allocation10_spill]] %s2957_s28  ;;  %s42_s20 = sadd.s32 1, %s2965_s0 }
  0x14   : > { %3673 = sst [smem:[#allocation11_spill]] %s2961_s29  ;;  %p481_p1 = scmp.ne.s32.totalorder %s2949_s26, %s2945_s25 }
  0x15   : > { %3674 = sst [smem:[#allocation12_spill]] %s2965_s0  ;;  %p482_p2 = scmp.eq.s32.totalorder %s2618_s18, 3 }
  0x16   : > { %3675 = sst [smem:[#allocation13_spill]] %s2969_s30  ;;  %s3715_s1 = smov (%p40_p0, %s39_s1), 0 }
  0x17   : > { %3676 = sst [smem:[#allocation14_spill]] %s3715_s1  ;;  %s3717_s20 = smov (!%p40_p0, %s42_s20), %s2965_s0 }
  0x18   : > { %p3123_p3 = por %p482_p2, %p481_p1  ;;  %p487_p4 = scmp.ne.s32.totalorder %s2945_s25, %s2941_s24 }
  0x19   : > { %p44_p5 = scmp.ge.s32.totalorder %s3717_s20, 2  ;;  %p488_p6 = scmp.eq.s32.totalorder %s2619_s19, 3 }
  0x1a   : > { %s3677_s21 = scalar_select %p3123_p3, 1, 0 }
  0x1b   : > { %p2622_p7 = scmp.ge.s32.totalorder %s2969_s30, 1  ;;  %p605_p8 = scmp.lt.s32.totalorder %s2969_s30, 5 }
  0x1c   : > { %3678 = sst [smem:[#allocation15_spill]] %s3677_s21  ;;  %s3719_s20 = smov (%p44_p5, %s3717_s20), 0 }
  0x1d   : > { %3679 = sst [smem:[#allocation16_spill]] %s3719_s20  ;;  %p3133_p9 = por %p488_p6, %p487_p4 }
  0x1e   : > { %p606_p10 = pnand %p2622_p7, %p605_p8  ;;  %s468_s23 = ssub.s32 %s2965_s0, %s3719_s20 }
  0x1f   : > { %s3680_s22 = scalar_select %p3133_p9, 1, 0 }
  0x20   : > { %s471_s18 = sadd.s32 1, %s2949_s26  ;;  %p469_p11 = scmp.eq.s32.totalorder %s468_s23, 0 }
  0x21   : > { %3681 = sst [smem:[#allocation17_spill]] %s3680_s22  ;;  %609 = sbr.rel (%p606_p10) target bundleno = 3390 (0xd3e), region = 88 }
  0x22   : > { %s3141_s1 = scalar_select %p469_p11, %s2949_s26, %s471_s18  }
  0x23   : > { %s3648_s19 = sand.u32 (!%p606_p10), 1, %s2945_s25   ;;  %p700_p12 = scmp.lt.s32.totalorder (!%p606_p10), %s2957_s28, 1 }
  0x24   : > { %3682 = sst [smem:[#allocation18_spill]] %s3141_s1  ;;  %s2623_s29 = sshll.u32 (!%p606_p10), %s3648_s19, 4 }
  0x25   : > { %p705_p13 = scmp.lt.s32.totalorder (!%p606_p10), %s2953_s27, 1  ;;  %s3683_s0 = sld [smem:[#allocation19_spill]] (!%p606_p10) }
  0x26   : > { %s3685_s7 = sld [smem:[#allocation23_spill]] (!%p606_p10)  ;;  %s3686_s8 = sld [smem:[#allocation24_spill]] (!%p606_p10) }
  0x27   : > { %s3212_s16 = scalar_lea.vmem (!%p606_p10), [#allocation3], %s2623_s29  ;;  %s3687_s2 = sld [smem:[#allocation9_spill]] (!%p606_p10) }
  0x28   : > { %s701_s24 = scalar_select %p700_p12, %s2957_s28, 1 }
  0x29   : > { %s3150_s22 = scalar_select %p705_p13, %s2953_s27, 1 }
  0x2a   : > { %s2673_s23 = sshll.u32 %s701_s24, 4 }
  0x2b   : > { %s3155_s19 = scalar_lea.vmem %s3683_s0, %s2673_s23  ;;  %s2674_s20 = sshll.u32 %s3150_s22, 6 }
  0x2c   : > { %s3177_s23 = scalar_lea.vmem %s3685_s7, %s2674_s20  ;;  %s2628_s26 = sshll.u32 %s3150_s22, 1 }
  0x2d   : > { %s3183_s17 = scalar_lea.vmem %s3686_s8, %s2628_s26  ;;  %s3188_s15 = scalar_lea.vmem %s3633_s9, %s2674_s20 }
  0x2e   : > { %s733_s24 = scalar_lea.vmem %s3634_s10, %s3150_s22  ;;  %s739_s6 = scalar_lea.vmem %s3636_s12, %s3150_s22 }
  0x2f   : > { %s2676_s30 = sshll.u32 %s3150_s22, 5  ;;  %s747_s21 = scalar_lea.vmem %s3638_s14, %s3150_s22 }
  0x30   : > { %s3206_s8 = scalar_lea.vmem %s3637_s13, %s2676_s30  ;;  %p2633_p0 = scmp.ne.s32.totalorder %s3687_s2, 0 }
  0x31   : > { %s3688_s18 = sld [smem:[#allocation20_spill]] (!%p2633_p0)  ;;  %v2971_v3 = vmov (!%p2633_p0), 0.0   ;;  %vm2972_vm0 = vmmov (!%p2633_p0), 0   ;;  %v753_v13 = vld [vmem:[%s3155_s19] sm:$0xff] (!%p2633_p0)  ;;  %v754_v14 = vld [vmem:[%s3155_s19 + $0x8] sm:$0xff] (!%p2633_p0)  ;;  %vm770_vm1 = vcmask (!%p2633_p0), 523264  }
  0x32   : > { %752 = sbr.rel (%p2633_p0) target bundleno = 290 (0x122), region = 92  ;;  %2699 = vmatprep.subr.bf16.mxu0 (!%p2633_p0), %v2971_v3  ;;  %2707 = vmatprep.mubr.msk.bf16.mxu0 (!%p2633_p0), %vm2972_vm0, %v2971_v3  ;;  %v763_v15 = vpack.c.bf16 (!%p2633_p0), %v754_v14, %v753_v13  ;;  %s3689_s1 = sld [smem:[#allocation21_spill]] (!%p2633_p0)  ;;  %vm815_vm2 = vcmask (!%p2633_p0), 261120  }
  0x37   : > { %v755_v0 = vld [vmem:[%s3688_s18] sm:$0xff] (!%p2633_p0)  ;;  %v756_v1 = vld [vmem:[%s3688_s18 + $0x8] sm:$0xff] (!%p2633_p0)  ;;  %v757_v2 = vld [vmem:[%s3688_s18 + $0x10] sm:$0xff] (!%p2633_p0) }
  0x38   : > { %v764_v4 = vpack.c.bf16 (!%p2633_p0), %v756_v1, %v755_v0  ;;  %v758_v5 = vld [vmem:[%s3688_s18 + $0x18] sm:$0xff] (!%p2633_p0)  ;;  %v759_v7 = vld [vmem:[%s3688_s18 + $0x20] sm:$0xff] (!%p2633_p0)  ;;  %v760_v8 = vld [vmem:[%s3688_s18 + $0x28] sm:$0xff] (!%p2633_p0) }
  0x39   : > { %v765_v6 = vpack.c.bf16 %v758_v5, %v757_v2  ;;  %v766_v9 = vpack.c.bf16 %v760_v8, %v759_v7  ;;  %v761_v10 = vld [vmem:[%s3688_s18 + $0x30] sm:$0xff]  ;;  %v762_v11 = vld [vmem:[%s3688_s18 + $0x38] sm:$0xff]  ;;  %v768_v16 = vld [vmem:[%s3689_s1] sm:$0xff] }
  0x3a   : > { %2700 = vmatpush3.bf16.msra.mxu0 %v764_v4  ;;  %v767_v12 = vpack.c.bf16 %v762_v11, %v761_v10  ;;  %v769_v18 = vld [vmem:[%s3689_s1 + $0x8] sm:$0xff] }
  0x3b   : > { %2701 = vmatprep.subr.bf16.mxu0 %v2971_v3 }
  0x3e   : > { %2702 = vmatpush3.bf16.msra.mxu0 %v765_v6 }
  0x3f   : > { %2703 = vmatprep.subr.bf16.mxu0 %v2971_v3 }
  0x42   : > { %2704 = vmatpush3.bf16.msra.mxu0 %v766_v9 }
  0x43   : > { %2705 = vmatprep.subr.bf16.mxu0 %v2971_v3 }
  0x46   : > { %2706 = vmatpush3.bf16.msra.mxu0 %v767_v12 }
  0x49   : > { %2708 = vmatmul.mubr.msk.bf16.vlgmr.msra.gmra.mrb[0].mxu0 %vm770_vm1, %v763_v15 }
 0x11c   : > { %v808_v17 = vpop.f32.mrb[0].mxu0 }
 0x11d   : > { %v809_v19 = vadd.f32 %v808_v17, %v768_v16  ;;  %v2709_v20 = vpop.f32.mrb[1].mxu0 }
 0x11e   : > { %v811_v21 = vpop.f32.mrb[2].mxu0 }
 0x11f   : > { %816 = vst.msk [vmem:[#allocation2] sm:$0xff] %vm815_vm2, %v809_v19  ;;  %v812_v22 = vadd.f32 %v811_v21, %v769_v18  ;;  %v2710_v23 = vpop.f32.mrb[3].mxu0 }
 0x121   : > { %817 = vst.msk [vmem:[#allocation2 + $0x8] sm:$0xff] %vm815_vm2, %v812_v22 }
 0x122 PF: > { %vm822_vm3 = vcmask 261120   ;;  %s3690_s27 = scalar_lea.vmem %s3627_s3, %s3150_s22  ;;  %s3691_s0 = scalar_lea.vmem %s3628_s4, %s3150_s22  ;;  %v911_v2 = vld [vmem:[%s3177_s23 + $0x8] sm:$0xff]  ;;  %v913_v3 = vld [vmem:[%s3177_s23 + $0x18] sm:$0xff]  ;;  %v910_v5 = vld [vmem:[%s3177_s23] sm:$0xff]  ;;  %v2973_v13 = vmov 0   ;;  %vm2979_vm4 = vmmov 0  }
 0x123   : > { %v2635_v45 = vld [vmem:[%s3690_s27] ss:$0 sm:$0xff]  ;;  %v920_v4 = vpack.c.bf16 %v913_v3, %v911_v2  ;;  %v912_v6 = vld [vmem:[%s3177_s23 + $0x10] sm:$0xff]  ;;  %v915_v8 = vld [vmem:[%s3177_s23 + $0x28] sm:$0xff]  ;;  %970 = vmatprep.mubr.bf16.mxu0 %v2973_v13  ;;  %s3693_s20 = sld [smem:[#allocation22_spill]]  ;;  %s2975_s2 = smov 96  }
 0x124   : > { %v2636_v47 = vld [vmem:[%s3691_s0] ss:$0 sm:$0xff]  ;;  %v919_v7 = vpack.c.bf16 %v912_v6, %v910_v5  ;;  %v917_v9 = vld [vmem:[%s3177_s23 + $0x38] sm:$0xff]  ;;  %v916_v12 = vld [vmem:[%s3177_s23 + $0x30] sm:$0xff]  ;;  %s2976_s27 = smov 64   ;;  %vm1807_vm5 = vcmask 130048   ;;  %s3695_s0 = scalar_lea.vmem %s3635_s11, %s3150_s22 }
 0x125   : > { %938 = vmatprep.subr.bf16.mxu0 %v920_v4  ;;  %v914_v10 = vld [vmem:[%s3177_s23 + $0x20] sm:$0xff]  ;;  %v922_v11 = vpack.c.bf16 %v917_v9, %v915_v8  ;;  %s3692_s23 = scalar_lea.vmem %s3629_s5, %s3150_s22  ;;  %vm2206_vm6 = vcmask 523264  }
 0x126   : > { %v3247_v24 = vld [vmem:[#allocation2] sm:$0xff]  ;;  %939 = vmatpush1.bf16.msra.mxu0 %v919_v7  ;;  %v921_v14 = vpack.c.bf16 %v916_v12, %v914_v10 }
 0x127   : > { %v823_v26 = vsel %vm822_vm3, %v3247_v24, 0.0  ;;  %940 = vmatprep.subr.bf16.mxu0 %v922_v11  ;;  %v2637_v23 = vld [vmem:[%s3692_s23] ss:$0 sm:$0xff] }
 0x128   : > { %v3249_v25 = vld [vmem:[#allocation2 + $0x8] sm:$0xff]  ;;  %824 = vadd.xlane.f32.xlu0 %v823_v26 }
 0x129   : > { %v826_v27 = vsel %vm822_vm3, %v3249_v25, 0.0  ;;  %s3694_s19 = scalar_lea.vmem %s3693_s20, %s3150_s22  ;;  %s3697_s22 = sld [smem:[#allocation10_spill]] }
 0x12a   : > { %941 = vmatpush1.bf16.msra.mxu0 %v921_v14  ;;  %s3698_s20 = sld [smem:[#allocation25_spill]] }
 0x12c   : > { %827 = vadd.xlane.f32.xlu0 %v826_v27 }
 0x12f   : > { %s2677_s28 = sshll.u32 %s3697_s22, 8  ;;  %s2981_s22 = smov [#allocation3]  }
 0x1b5   : > { %v825_v28 = vpop.xlane.xlu0 %824 }
 0x1b6   : > { %v830_v29 = vmul.f32 0.03125, %v825_v28 }
 0x1b8   : > { %v832_v30 = vsub.f32 %v3247_v24, %v830_v29  ;;  %v2638_v29 = vld [vmem:[%s3694_s19] ss:$0 sm:$0xff] }
 0x1b9   : > { %v828_v31 = vpop.xlane.xlu0 %827 }
 0x1ba   : > { %v831_v32 = vmul.f32 0.03125, %v828_v31  ;;  %v834_v33 = vmul.f32 %v832_v30, %v832_v30 }
 0x1bc   : > { %v833_v34 = vsub.f32 %v3249_v25, %v831_v32  ;;  %v836_v35 = vsel %vm822_vm3, %v834_v33, 0.0 }
 0x1bd   : > { %837 = vadd.xlane.f32.xlu1 %v836_v35  ;;  %v925_v35 = vlaneseq }
 0x1be   : > { %v835_v36 = vmul.f32 %v833_v34, %v833_v34 }
 0x1c0   : > { %v839_v37 = vsel %vm822_vm3, %v835_v36, 0.0  ;;  %v3294_v36 = vshrl.u32 %v925_v35, 7 }
 0x1c1   : > { %840 = vadd.xlane.f32.xlu1 %v839_v37 }
 0x1c2   : > { %v927_v37 = vsub.s32 0, %v3294_v36 }
 0x24a   : > { %v838_v38 = vpop.xlane.xlu1 %837 }
 0x24b   : > { %v842_v39 = vmul.f32 0.03125, %v838_v38  ;;  %v3298_v38 = vld [vmem:[%s3183_s17] sm:$0x3]  ;;  %s2980_s17 = smov 32  }
 0x24d   : > { %v844_v40 = vadd.f32 1e-05, %v842_v39  ;;  %v928_v39 = vrot.slane %v3298_v38, %v927_v37 }
 0x24e   : > { %v841_v41 = vpop.xlane.xlu1 %840 }
 0x24f   : > { %2843 = vrsqrt.f32 %v844_v40  ;;  %v843_v42 = vmul.f32 0.03125, %v841_v41 }
 0x251   : > { %v845_v43 = vadd.f32 1e-05, %v843_v42 }
 0x253   : > { %2845 = vrsqrt.f32 %v845_v43 }
 0x259   : > { %v2844_v44 = vpop.eup %2843 }
 0x25a   : > { %v848_v46 = vmul.f32 %v2844_v44, %v832_v30 }
 0x25c   : > { %v856_v48 = vmul.f32 %v2635_v45, %v848_v46  ;;  %v2977_v46 = vmov 1983009808  }
 0x25d   : > { %v2846_v49 = vpop.eup %2845 }
 0x25e   : > { %v864_v50 = vadd.f32 %v2636_v47, %v856_v48  ;;  %v849_v51 = vmul.f32 %v2846_v49, %v833_v34  ;;  %v2974_v34 = vmov 0.0   ;;  %v2978_v49 = vmov 1934713408  }
 0x25f   : > { %2711 = vmatprep.subr.bf16.mxu1 %v2974_v34  ;;  %2717 = vmatprep.subr.bf16.mxu0 %v2974_v34 }
 0x260   : > { %v868_v52 = vsel %vm822_vm3, %v864_v50, 0.0  ;;  %v857_v53 = vmul.f32 %v2635_v45, %v849_v51  ;;  %2713 = vmatprep.mubr.msk.bf16.mxu1 %vm2979_vm4, %v2974_v34 }
 0x261   : > { %869 = vadd.xlane.f32.xlu0 %v868_v52 }
 0x262   : > { %v865_v54 = vadd.f32 %v2636_v47, %v857_v53  ;;  %v991_v47 = vunpack.c.l.s4 %v2977_v46 }
 0x264   : > { %v871_v55 = vsel %vm822_vm3, %v865_v54, 0.0  ;;  %v992_v48 = vunpack.c.0.s8 %v991_v47 }
 0x265   : > { %872 = vadd.xlane.f32.xlu1 %v871_v55 }
 0x266   : > { %v3308_v51 = vsub.s32 %v992_v48, %v3294_v36 }
 0x2ee   : > { %v870_v56 = vpop.xlane.xlu0 %869 }
 0x2ef   : > { %v874_v57 = vmul.f32 0.03125, %v870_v56 }
 0x2f1   : > { %v876_v58 = vsub.f32 %v864_v50, %v874_v57  ;;  %v1022_v50 = vunpack.c.l.s4 %v2978_v49 }
 0x2f2   : > { %v873_v59 = vpop.xlane.xlu1 %872 }
 0x2f3   : > { %v875_v60 = vmul.f32 0.03125, %v873_v59  ;;  %v878_v61 = vmul.f32 %v876_v58, %v876_v58  ;;  %v1023_v52 = vunpack.c.0.s8 %v1022_v50 }
 0x2f5   : > { %v877_v62 = vsub.f32 %v865_v54, %v875_v60  ;;  %v880_v63 = vsel %vm822_vm3, %v878_v61, 0.0  ;;  %v3312_v55 = vsub.s32 %v1023_v52, %v3294_v36 }
 0x2f6   : > { %881 = vadd.xlane.f32.xlu0 %v880_v63 }
 0x2f7   : > { %v879_v0 = vmul.f32 %v877_v62, %v877_v62 }
 0x2f9   : > { %v883_v1 = vsel %vm822_vm3, %v879_v0, 0.0 }
 0x2fa   : > { %884 = vadd.xlane.f32.xlu1 %v883_v1 }
 0x383   : > { %v882_v15 = vpop.xlane.xlu0 %881 }
 0x384   : > { %v886_v16 = vmul.f32 0.03125, %v882_v15 }
 0x386   : > { %v888_v17 = vadd.f32 1e-05, %v886_v16 }
 0x387   : > { %v885_v18 = vpop.xlane.xlu1 %884 }
 0x388   : > { %2847 = vrsqrt.f32 %v888_v17  ;;  %v887_v19 = vmul.f32 0.03125, %v885_v18 }
 0x38a   : > { %v889_v20 = vadd.f32 1e-05, %v887_v19 }
 0x38c   : > { %2849 = vrsqrt.f32 %v889_v20 }
 0x392   : > { %v2848_v21 = vpop.eup %2847 }
 0x393   : > { %v892_v22 = vmul.f32 %v2848_v21, %v876_v58 }
 0x395   : > { %v900_v28 = vmul.f32 %v2637_v23, %v892_v22 }
 0x396   : > { %v2850_v26 = vpop.eup %2849 }
 0x397   : > { %v893_v27 = vmul.f32 %v2850_v26, %v877_v62  ;;  %v908_v31 = vadd.f32 %v2638_v29, %v900_v28 }
 0x399   : > { %v901_v30 = vmul.f32 %v2637_v23, %v893_v27 }
 0x39b   : > { %v909_v32 = vadd.f32 %v2638_v29, %v901_v30 }
 0x39d   : > { %v918_v33 = vpack.c.bf16 %v909_v32, %v908_v31 }
 0x39f   : > { %2639 = vmatmul.mubr.msk.bf16.vlgmr.msra.gmra.mrb[0].mxu0 %vm822_vm3, %v918_v33 }
 0x3a0   : > { %2719 = vmatprep.mubr.msk.bf16.mxu0 %vm2979_vm4, %v2974_v34 }
 0x472   : > { %v972_v40 = vpop.f32.mrb[0].mxu0 }
 0x473   : > { %v973_v41 = vadd.f32 %v972_v40, %v928_v39  ;;  %v3301_v42 = vpop.f32.mrb[1].mxu0 }
 0x474   : > { %v976_v43 = vpop.f32.mrb[2].mxu0 }
 0x475   : > { %v977_v44 = vadd.f32 %v976_v43, %v928_v39  ;;  %v3303_v45 = vpop.f32.mrb[3].mxu0  ;;  %983 = vrot.lane.b32.xlu0 %v973_v41, %s2975_s2  ;;  %v989_v53 = vcombine.high %v973_v41, %v2974_v34  ;;  %v996_v56 = vrot.slane %v973_v41, %v3308_v51 }
 0x477   : > { %985 = vrot.lane.b32.xlu1 %v977_v44, %s2975_s2  ;;  %v1055_v59 = vcombine.high %v977_v44, %v2974_v34  ;;  %v1003_v60 = vrot.slane %v989_v53, %v3308_v51  ;;  %v1062_v2 = vrot.slane %v977_v44, %v3308_v51 }
 0x479   : > { %v1069_v8 = vrot.slane %v1055_v59, %v3308_v51 }
 0x47b   : > { %1221 = vrot.lane.b32.xlu1 %v973_v41, %s2976_s27 }
 0x47f   : > { %1223 = vrot.lane.b32.xlu1 %v977_v44, %s2976_s27 }
 0x4e7   : > { %v984_v54 = vpop.permute.xlu0 %983 }
 0x4e8   : > { %v1004_v57 = vcombine.high %v984_v54, %v2974_v34  ;;  %v1011_v58 = vrot.slane %v984_v54, %v3308_v51  ;;  %1225 = vrot.lane.b32.xlu0 %v984_v54, %s2976_s27 }
 0x4e9   : > { %v986_v61 = vpop.permute.xlu1 %985 }
 0x4ea   : > { %v1018_v62 = vrot.slane %v1004_v57, %v3308_v51  ;;  %v1019_v63 = vcombine.low %v996_v56, %v1011_v58  ;;  %v1020_v0 = vcombine.high %v996_v56, %v1011_v58  ;;  %v1070_v1 = vcombine.high %v986_v61, %v2974_v34  ;;  %1227 = vrot.lane.b32.xlu1 %v986_v61, %s2976_s27  ;;  %s3699_s27 = sld [smem:[#allocation26_spill]] }
 0x4eb   : > { %v1077_v3 = vrot.slane %v986_v61, %v3308_v51 }
 0x4ec   : > { %v1027_v4 = vrot.slane %v1019_v63, %v3312_v55  ;;  %v1034_v5 = vrot.slane %v1020_v0, %v3312_v55  ;;  %v1035_v6 = vcombine.low %v1003_v60, %v1018_v62  ;;  %v1036_v7 = vcombine.high %v1003_v60, %v1018_v62 }
 0x4ed   : > { %v1084_v9 = vrot.slane %v1070_v1, %v3308_v51  ;;  %v1085_v10 = vcombine.low %v1062_v2, %v1077_v3  ;;  %v1086_v11 = vcombine.high %v1062_v2, %v1077_v3  ;;  %v1222_v59 = vpop.permute.xlu1 %1221 }
 0x4ee   : > { %v1043_v12 = vrot.slane %v1035_v6, %v3312_v55  ;;  %v1050_v13 = vrot.slane %v1036_v7, %v3312_v55  ;;  %v1121_v14 = vcombine.low %v1027_v4, %v1034_v5  ;;  %v2640_v15 = vcombine.high %v1027_v4, %v1034_v5 }
 0x4ef   : > { %v1093_v16 = vrot.slane %v1085_v10, %v3312_v55  ;;  %v1100_v17 = vrot.slane %v1086_v11, %v3312_v55  ;;  %v1101_v18 = vcombine.low %v1069_v8, %v1084_v9  ;;  %v1102_v19 = vcombine.high %v1069_v8, %v1084_v9 }
 0x4f0   : > { %v1128_v20 = vrot.slane %v1121_v14, %v3308_v51  ;;  %v1136_v21 = vrot.slane %v2640_v15, %v3308_v51  ;;  %v1137_v22 = vcombine.low %v1043_v12, %v1050_v13  ;;  %v2641_v23 = vcombine.high %v1043_v12, %v1050_v13 }
 0x4f1   : > { %v1109_v26 = vrot.slane %v1101_v18, %v3312_v55  ;;  %v1116_v27 = vrot.slane %v1102_v19, %v3312_v55  ;;  %v1171_v28 = vcombine.low %v1093_v16, %v1100_v17  ;;  %v2642_v29 = vcombine.high %v1093_v16, %v1100_v17  ;;  %v1224_v61 = vpop.permute.xlu1 %1223 }
 0x4f2   : > { %v1144_v30 = vrot.slane %v1137_v22, %v3308_v51  ;;  %v1152_v31 = vrot.slane %v2641_v23, %v3308_v51  ;;  %v1153_v41 = vcombine.low %v1128_v20, %v1136_v21  ;;  %v1233_v60 = vcombine.high %v1222_v59, %v2974_v34 }
 0x4f3   : > { %v1178_v32 = vrot.slane %v1171_v28, %v3308_v51  ;;  %v1186_v33 = vrot.slane %v2642_v29, %v3308_v51  ;;  %v1187_v35 = vcombine.low %v1109_v26, %v1116_v27  ;;  %v2643_v37 = vcombine.high %v1109_v26, %v1116_v27 }
 0x4f4   : > { %v1161_v43 = vcombine.low %v1144_v30, %v1152_v31  ;;  %v1160_v48 = vrot.slane %v1153_v41, %v3312_v55  ;;  %v1240_v63 = vrot.slane %v1222_v59, %v3308_v51  ;;  %v1247_v2 = vrot.slane %v1233_v60, %v3308_v51 }
 0x4f5   : > { %v1194_v39 = vrot.slane %v1187_v35, %v3308_v51  ;;  %v1202_v40 = vrot.slane %v2643_v37, %v3308_v51  ;;  %v1203_v44 = vcombine.low %v1178_v32, %v1186_v33  ;;  %v1299_v3 = vcombine.high %v1224_v61, %v2974_v34 }
 0x4f6   : > { %v1168_v47 = vrot.slane %v1161_v43, %v3312_v55  ;;  %v1306_v9 = vrot.slane %v1224_v61, %v3308_v51 }
 0x4f7   : > { %v1211_v46 = vcombine.low %v1194_v39, %v1202_v40  ;;  %v1210_v49 = vrot.slane %v1203_v44, %v3312_v55  ;;  %v1313_v15 = vrot.slane %v1299_v3, %v3308_v51 }
 0x4f8   : > { %v1169_v52 = vcombine.low %v1160_v48, %v1168_v47  ;;  %v1170_v53 = vcombine.high %v1160_v48, %v1168_v47 }
 0x4f9   : > { %v1218_v50 = vrot.slane %v1211_v46, %v3312_v55 }
 0x4fb   : > { %v1219_v54 = vcombine.low %v1210_v49, %v1218_v50  ;;  %v1220_v56 = vcombine.high %v1210_v49, %v1218_v50 }
 0x4fd   : > { %v3349_v57 = vpack.c.bf16 %v1219_v54, %v1169_v52  ;;  %v3351_v58 = vpack.c.bf16 %v1220_v56, %v1170_v53 }
 0x55a   : > { %v1226_v62 = vpop.permute.xlu0 %1225 }
 0x55b   : > { %v1248_v0 = vcombine.high %v1226_v62, %v2974_v34  ;;  %v1255_v1 = vrot.slane %v1226_v62, %v3308_v51 }
 0x55c   : > { %v1228_v4 = vpop.permute.xlu1 %1227 }
 0x55d   : > { %v1262_v5 = vrot.slane %v1248_v0, %v3308_v51  ;;  %v1263_v6 = vcombine.low %v1240_v63, %v1255_v1  ;;  %v1264_v7 = vcombine.high %v1240_v63, %v1255_v1  ;;  %v1314_v8 = vcombine.high %v1228_v4, %v2974_v34 }
 0x55e   : > { %v1321_v10 = vrot.slane %v1228_v4, %v3308_v51 }
 0x55f   : > { %v1271_v11 = vrot.slane %v1263_v6, %v3312_v55  ;;  %v1278_v12 = vrot.slane %v1264_v7, %v3312_v55  ;;  %v1279_v13 = vcombine.low %v1247_v2, %v1262_v5  ;;  %v1280_v14 = vcombine.high %v1247_v2, %v1262_v5 }
 0x560   : > { %v1328_v16 = vrot.slane %v1314_v8, %v3308_v51  ;;  %v1329_v17 = vcombine.low %v1306_v9, %v1321_v10  ;;  %v1330_v18 = vcombine.high %v1306_v9, %v1321_v10 }
 0x561   : > { %v1287_v19 = vrot.slane %v1279_v13, %v3312_v55  ;;  %v1294_v20 = vrot.slane %v1280_v14, %v3312_v55  ;;  %v1365_v21 = vcombine.low %v1271_v11, %v1278_v12  ;;  %v2644_v22 = vcombine.high %v1271_v11, %v1278_v12 }
 0x562   : > { %v1337_v23 = vrot.slane %v1329_v17, %v3312_v55  ;;  %v1344_v26 = vrot.slane %v1330_v18, %v3312_v55  ;;  %v1345_v27 = vcombine.low %v1313_v15, %v1328_v16  ;;  %v1346_v28 = vcombine.high %v1313_v15, %v1328_v16 }
 0x563   : > { %v1372_v29 = vrot.slane %v1365_v21, %v3308_v51  ;;  %v1380_v30 = vrot.slane %v2644_v22, %v3308_v51  ;;  %v1381_v31 = vcombine.low %v1287_v19, %v1294_v20  ;;  %v2645_v32 = vcombine.high %v1287_v19, %v1294_v20 }
 0x564   : > { %v1353_v33 = vrot.slane %v1345_v27, %v3312_v55  ;;  %v1360_v35 = vrot.slane %v1346_v28, %v3312_v55  ;;  %v1415_v37 = vcombine.low %v1337_v23, %v1344_v26  ;;  %v2646_v39 = vcombine.high %v1337_v23, %v1344_v26 }
 0x565   : > { %v1388_v40 = vrot.slane %v1381_v31, %v3308_v51  ;;  %v1396_v41 = vrot.slane %v2645_v32, %v3308_v51  ;;  %v1397_v49 = vcombine.low %v1372_v29, %v1380_v30 }
 0x566   : > { %v1422_v43 = vrot.slane %v1415_v37, %v3308_v51  ;;  %v1430_v44 = vrot.slane %v2646_v39, %v3308_v51  ;;  %v1431_v46 = vcombine.low %v1353_v33, %v1360_v35  ;;  %v2647_v47 = vcombine.high %v1353_v33, %v1360_v35 }
 0x567   : > { %v1405_v48 = vcombine.low %v1388_v40, %v1396_v41  ;;  %v1404_v59 = vrot.slane %v1397_v49, %v3312_v55 }
 0x568   : > { %v1438_v50 = vrot.slane %v1431_v46, %v3308_v51  ;;  %v1446_v52 = vrot.slane %v2647_v47, %v3308_v51  ;;  %v1447_v53 = vcombine.low %v1422_v43, %v1430_v44  ;;  %v931_v47 = vsub.s32 1, %v3294_v36 }
 0x569   : > { %v1412_v54 = vrot.slane %v1405_v48, %v3312_v55 }
 0x56a   : > { %v1455_v56 = vcombine.low %v1438_v50, %v1446_v52  ;;  %v1454_v60 = vrot.slane %v1447_v53, %v3312_v55  ;;  %v932_v48 = vrot.slane %v3298_v38, %v931_v47 }
 0x56b   : > { %v1413_v62 = vcombine.low %v1404_v59, %v1412_v54  ;;  %v1414_v0 = vcombine.high %v1404_v59, %v1412_v54 }
 0x56c   : > { %v1462_v61 = vrot.slane %v1455_v56, %v3312_v55  ;;  %v979_v49 = vadd.f32 %v3303_v45, %v932_v48  ;;  %v975_v50 = vadd.f32 %v3301_v42, %v932_v48 }
 0x56e   : > { %v1463_v63 = vcombine.low %v1454_v60, %v1462_v61  ;;  %v1464_v1 = vcombine.high %v1454_v60, %v1462_v61  ;;  %v1473_v56 = vcombine.high %v975_v50, %v2974_v34  ;;  %v1480_v61 = vrot.slane %v975_v50, %v3308_v51 }
 0x56f   : > { %v1539_v42 = vcombine.high %v979_v49, %v2974_v34 }
 0x570   : > { %v1707_v2 = vpack.c.bf16 %v1463_v63, %v1413_v62  ;;  %v1708_v3 = vpack.c.bf16 %v1464_v1, %v1414_v0  ;;  %v1487_v45 = vrot.slane %v1473_v56, %v3308_v51 }
 0x572   : > { %v1713_v4 = vsel %vm822_vm3, %v1707_v2, 0  ;;  %v1760_v5 = vsel %vm822_vm3, %v1708_v3, 0  ;;  %v1546_v2 = vrot.slane %v979_v49, %v3308_v51 }
 0x573   : > { %2712 = vmatpush3.bf16.xpose.msra.mxu1 %v1713_v4  ;;  %2718 = vmatpush3.bf16.xpose.msra.mxu0 %v1760_v5 }
 0x574   : > { %2723 = vmatprep.subr.bf16.mxu1 %v2974_v34  ;;  %2729 = vmatprep.subr.bf16.mxu0 %v2974_v34 }
 0x57a   : > { %2714 = vmatmul.mubr.msk.bf16.vlgmr.msra.gmra.mrb[0].mxu1 %vm822_vm3, %v3349_v57  ;;  %2720 = vmatmul.mubr.msk.bf16.vlgmr.msra.gmra.mrb[4].mxu0 %vm822_vm3, %v3351_v58 }
 0x57b   : > { %2725 = vmatprep.mubr.msk.bf16.mxu1 %vm2979_vm4, %v2974_v34  ;;  %2731 = vmatprep.mubr.msk.bf16.mxu0 %vm2979_vm4, %v2974_v34 }
 0x64d   : > { %v1749_v6 = vpop.f32.mrb[0].mxu1  ;;  %v1796_v7 = vpop.f32.mrb[4].mxu0 }
 0x64e   : > { %v1803_v8 = vmul.f32 0.17677669, %v1749_v6  ;;  %v2715_v9 = vpop.f32.mrb[1].mxu1  ;;  %v2721_v10 = vpop.f32.mrb[5].mxu0  ;;  %v1805_v15 = vmul.f32 0.17677669, %v1796_v7 }
 0x64f   : > { %v1752_v11 = vpop.f32.mrb[2].mxu1  ;;  %v1799_v12 = vpop.f32.mrb[6].mxu0  ;;  %v1553_v9 = vrot.slane %v1539_v42, %v3308_v51 }
 0x650   : > { %v1804_v13 = vmul.f32 0.17677669, %v1752_v11  ;;  %v2716_v14 = vpop.f32.mrb[3].mxu1  ;;  %v2722_v57 = vpop.f32.mrb[7].mxu0  ;;  %v1808_v58 = vsel %vm1807_vm5, %v1803_v8, -inf  ;;  %v1814_v18 = vsel %vm1807_vm5, %v1805_v15, -inf }
 0x651   : > { %1809 = vmax.xlane.f32.xlu0 %v1808_v58  ;;  %v1806_v17 = vmul.f32 0.17677669, %v1799_v12 }
 0x652   : > { %v1811_v16 = vsel %vm1807_vm5, %v1804_v13, -inf }
 0x653   : > { %1812 = vmax.xlane.f32.xlu1 %v1811_v16  ;;  %v1817_v19 = vsel %vm1807_vm5, %v1806_v17, -inf }
 0x655   : > { %1815 = vmax.xlane.f32.xlu0 %v1814_v18 }
 0x659   : > { %1818 = vmax.xlane.f32.xlu0 %v1817_v19 }
 0x6de   : > { %v1810_v20 = vpop.xlane.xlu0 %1809 }
 0x6df   : > { %v1820_v21 = vsub.f32 %v1803_v8, %v1810_v20 }
 0x6e0   : > { %v1813_v22 = vpop.xlane.xlu1 %1812 }
 0x6e1   : > { %v1821_v23 = vsub.f32 %v1804_v13, %v1813_v22  ;;  %v1824_v26 = vmul.f32 1.442695, %v1820_v21 }
 0x6e2   : > { %v1816_v28 = vpop.xlane.xlu0 %1815 }
 0x6e3   : > { %v1826_v27 = vmul.f32 1.442695, %v1821_v23  ;;  %2851 = vpow2.f32 %v1824_v26  ;;  %v1822_v29 = vsub.f32 %v1805_v15, %v1816_v28 }
 0x6e5   : > { %2853 = vpow2.f32 %v1826_v27  ;;  %v1828_v30 = vmul.f32 1.442695, %v1822_v29 }
 0x6e6   : > { %v1819_v31 = vpop.xlane.xlu0 %1818 }
 0x6e7   : > { %2855 = vpow2.f32 %v1828_v30  ;;  %v1823_v32 = vsub.f32 %v1806_v17, %v1819_v31 }
 0x6e9   : > { %v1830_v33 = vmul.f32 1.442695, %v1823_v32 }
 0x6eb   : > { %2857 = vpow2.f32 %v1830_v33 }
 0x6ed   : > { %v3401_v35 = vpop.eup %2851 }
 0x6ee   : > { %v1832_v39 = vsel %vm1807_vm5, %v3401_v35, 0.0 }
 0x6ef   : > { %v3403_v37 = vpop.eup %2853  ;;  %1833 = vadd.xlane.f32.xlu0 %v1832_v39 }
 0x6f0   : > { %v1835_v40 = vsel %vm1807_vm5, %v3403_v37, 0.0 }
 0x6f1   : > { %1836 = vadd.xlane.f32.xlu1 %v1835_v40  ;;  %v3409_v41 = vpop.eup %2855 }
 0x6f2   : > { %v1838_v43 = vsel %vm1807_vm5, %v3409_v41, 0.0 }
 0x6f3   : > { %1839 = vadd.xlane.f32.xlu0 %v1838_v43 }
 0x6f5   : > { %v3413_v44 = vpop.eup %2857 }
 0x6f6   : > { %v1841_v46 = vsel %vm1807_vm5, %v3413_v44, 0.0 }
 0x6f7   : > { %1842 = vadd.xlane.f32.xlu1 %v1841_v46 }
 0x708   : > { %1469 = vrot.lane.b32.xlu1 %v979_v49, %s2975_s2 }
 0x709   : > { %1467 = vrot.lane.b32.xlu0 %v975_v50, %s2975_s2 }
 0x77c   : > { %v1834_v52 = vpop.xlane.xlu0 %1833 }
 0x77d   : > { %2859 = vrcp.f32 %v1834_v52 }
 0x77e   : > { %v1837_v53 = vpop.xlane.xlu1 %1836 }
 0x77f   : > { %2861 = vrcp.f32 %v1837_v53 }
 0x780   : > { %v1840_v54 = vpop.xlane.xlu0 %1839 }
 0x781   : > { %2863 = vrcp.f32 %v1840_v54 }
 0x784   : > { %v1468_v59 = vpop.permute.xlu0 %1467  ;;  %v1843_v60 = vpop.xlane.xlu1 %1842 }
 0x785   : > { %v1488_v36 = vcombine.high %v1468_v59, %v2974_v34  ;;  %v1495_v38 = vrot.slane %v1468_v59, %v3308_v51  ;;  %2865 = vrcp.f32 %v1843_v60 }
 0x787   : > { %v1502_v62 = vrot.slane %v1488_v36, %v3308_v51  ;;  %v1503_v63 = vcombine.low %v1480_v61, %v1495_v38  ;;  %v1504_v0 = vcombine.high %v1480_v61, %v1495_v38  ;;  %v2860_v43 = vpop.eup %2859 }
 0x788   : > { %v1470_v1 = vpop.permute.xlu1 %1469 }
 0x789   : > { %v1511_v3 = vrot.slane %v1503_v63, %v3312_v55  ;;  %v1518_v4 = vrot.slane %v1504_v0, %v3312_v55  ;;  %v1519_v5 = vcombine.low %v1487_v45, %v1502_v62  ;;  %v1520_v6 = vcombine.high %v1487_v45, %v1502_v62  ;;  %v2862_v46 = vpop.eup %2861 }
 0x78a   : > { %v1554_v7 = vcombine.high %v1470_v1, %v2974_v34  ;;  %v1561_v8 = vrot.slane %v1470_v1, %v3308_v51  ;;  %v1849_v62 = vmul.f32 %v2862_v46, %v3403_v37  ;;  %v2187_v37 = vld [vmem:[%s3188_s15 + $0x8] sm:$0xff] }
 0x78b   : > { %v1527_v10 = vrot.slane %v1519_v5, %v3312_v55  ;;  %v1534_v11 = vrot.slane %v1520_v6, %v3312_v55  ;;  %v1605_v12 = vcombine.low %v1511_v3, %v1518_v4  ;;  %v2648_v57 = vcombine.high %v1511_v3, %v1518_v4  ;;  %v2864_v52 = vpop.eup %2863  ;;  %v2189_v6 = vld [vmem:[%s3188_s15 + $0x18] sm:$0xff] }
 0x78c   : > { %v1568_v13 = vrot.slane %v1554_v7, %v3308_v51  ;;  %v1569_v14 = vcombine.low %v1546_v2, %v1561_v8  ;;  %v1570_v15 = vcombine.high %v1546_v2, %v1561_v8  ;;  %v1848_v2 = vmul.f32 %v2860_v43, %v3401_v35  ;;  %v2186_v35 = vld [vmem:[%s3188_s15] sm:$0xff] }
 0x78d   : > { %v1621_v58 = vcombine.low %v1527_v10, %v1534_v11  ;;  %v2649_v16 = vcombine.high %v1527_v10, %v1534_v11  ;;  %v1612_v21 = vrot.slane %v1605_v12, %v3308_v51  ;;  %v1620_v27 = vrot.slane %v2648_v57, %v3308_v51  ;;  %v2190_v8 = vld [vmem:[%s3188_s15 + $0x20] sm:$0xff] }
 0x78e   : > { %v1577_v17 = vrot.slane %v1569_v14, %v3312_v55  ;;  %v1585_v18 = vcombine.low %v1553_v9, %v1568_v13  ;;  %v1584_v19 = vrot.slane %v1570_v15, %v3312_v55  ;;  %v1586_v20 = vcombine.high %v1553_v9, %v1568_v13  ;;  %v2191_v9 = vld [vmem:[%s3188_s15 + $0x28] sm:$0xff] }
 0x78f   : > { %v1628_v22 = vrot.slane %v1621_v58, %v3308_v51  ;;  %v1636_v23 = vrot.slane %v2649_v16, %v3308_v51  ;;  %v1637_v47 = vcombine.low %v1612_v21, %v1620_v27  ;;  %v2866_v56 = vpop.eup %2865  ;;  %v1850_v3 = vmul.f32 %v2864_v52, %v3409_v41  ;;  %v2188_v41 = vld [vmem:[%s3188_s15 + $0x10] sm:$0xff] }
 0x790   : > { %v1593_v26 = vrot.slane %v1585_v18, %v3312_v55  ;;  %v1600_v28 = vrot.slane %v1586_v20, %v3312_v55  ;;  %v1655_v29 = vcombine.low %v1577_v17, %v1584_v19  ;;  %v2650_v30 = vcombine.high %v1577_v17, %v1584_v19 }
 0x791   : > { %v1645_v31 = vcombine.low %v1628_v22, %v1636_v23  ;;  %v1644_v59 = vrot.slane %v1637_v47, %v3312_v55  ;;  %v1851_v63 = vmul.f32 %v2866_v56, %v3413_v44  ;;  %v1852_v4 = vpack.c.bf16 %v1849_v62, %v1848_v2 }
 0x792   : > { %v1662_v32 = vrot.slane %v1655_v29, %v3308_v51  ;;  %v1670_v33 = vrot.slane %v2650_v30, %v3308_v51  ;;  %v1671_v39 = vcombine.low %v1593_v26, %v1600_v28  ;;  %v2651_v40 = vcombine.high %v1593_v26, %v1600_v28 }
 0x793   : > { %v1652_v53 = vrot.slane %v1645_v31, %v3312_v55  ;;  %v1853_v5 = vpack.c.bf16 %v1851_v63, %v1850_v3  ;;  %v2195_v44 = vpack.c.bf16 %v2187_v37, %v2186_v35  ;;  %v2196_v7 = vpack.c.bf16 %v2189_v6, %v2188_v41 }
 0x794   : > { %v1678_v48 = vrot.slane %v1671_v39, %v3308_v51  ;;  %v1686_v49 = vrot.slane %v2651_v40, %v3308_v51  ;;  %v1687_v50 = vcombine.low %v1662_v32, %v1670_v33  ;;  %v2197_v10 = vpack.c.bf16 %v2191_v9, %v2190_v8 }
 0x795   : > { %v1653_v36 = vcombine.low %v1644_v59, %v1652_v53  ;;  %v1654_v45 = vcombine.high %v1644_v59, %v1652_v53 }
 0x796   : > { %v1695_v54 = vcombine.low %v1678_v48, %v1686_v49  ;;  %v1694_v60 = vrot.slane %v1687_v50, %v3312_v55 }
 0x798   : > { %v1702_v61 = vrot.slane %v1695_v54, %v3312_v55 }
 0x79a   : > { %v1703_v38 = vcombine.low %v1694_v60, %v1702_v61  ;;  %v1704_v42 = vcombine.high %v1694_v60, %v1702_v61 }
 0x79c   : > { %v1854_v0 = vpack.c.bf16 %v1703_v38, %v1653_v36  ;;  %v1855_v1 = vpack.c.bf16 %v1704_v42, %v1654_v45 }
 0x79e   : > { %2724 = vmatpush3.bf16.msra.mxu1 %v1854_v0  ;;  %2730 = vmatpush3.bf16.msra.mxu0 %v1855_v1  ;;  %v2192_v0 = vld [vmem:[%s3188_s15 + $0x30] sm:$0xff]  ;;  %v2193_v1 = vld [vmem:[%s3188_s15 + $0x38] sm:$0xff] }
 0x79f   : > { %2735 = vmatprep.subr.bf16.mxu1 %v2974_v34  ;;  %2747 = vmatprep.subr.bf16.mxu0 %v2974_v34 }
 0x7a1   : > { %2726 = vmatmul.mubr.msk.bf16.vlgmr.msra.gmra.mrb[4].mxu1 %vm1807_vm5, %v1852_v4  ;;  %2732 = vmatmul.mubr.msk.bf16.vlgmr.msra.gmra.mrb[8].mxu0 %vm1807_vm5, %v1853_v5  ;;  %v2198_v5 = vpack.c.bf16 %v2193_v1, %v2192_v0 }
 0x7a2   : > { %2743 = vmatprep.mubr.msk.bf16.mxu1 %vm2979_vm4, %v2974_v34  ;;  %2751 = vmatprep.mubr.msk.bf16.mxu0 %vm2979_vm4, %v2974_v34 }
 0x7a3   : > { %2736 = vmatpush3.bf16.msra.mxu1 %v2195_v44 }
 0x7a4   : > { %2737 = vmatprep.subr.bf16.mxu1 %v2974_v34 }
 0x7a7   : > { %2738 = vmatpush3.bf16.msra.mxu1 %v2196_v7 }
 0x7a8   : > { %2739 = vmatprep.subr.bf16.mxu1 %v2974_v34 }
 0x7ab   : > { %2740 = vmatpush3.bf16.msra.mxu1 %v2197_v10 }
 0x7ac   : > { %2741 = vmatprep.subr.bf16.mxu1 %v2974_v34 }
 0x7af   : > { %2742 = vmatpush3.bf16.msra.mxu1 %v2198_v5  ;;  %v2663_v5 = vld [vmem:[%s739_s6] ss:$0 sm:$0xff]  ;;  %s3696_s6 = sld [smem:[#allocation9_spill]] }
 0x7b5   : > { %p2359_p1 = scmp.eq.s32.totalorder %s3696_s6, 1 }
 0x874   : > { %v1893_v11 = vpop.f32.mrb[4].mxu1  ;;  %v1937_v12 = vpop.f32.mrb[8].mxu0 }
 0x875   : > { %v1944_v13 = vcombine.high %v1893_v11, %v2974_v34  ;;  %v1951_v14 = vrot.slane %v1893_v11, %v3308_v51  ;;  %v1959_v57 = vcombine.high %v1937_v12, %v2974_v34  ;;  %v1966_v15 = vrot.slane %v1937_v12, %v3308_v51  ;;  %v2727_v58 = vpop.f32.mrb[5].mxu1  ;;  %v2733_v16 = vpop.f32.mrb[9].mxu0 }
 0x876   : > { %v1896_v17 = vpop.f32.mrb[6].mxu1  ;;  %v1940_v18 = vpop.f32.mrb[10].mxu0 }
 0x877   : > { %v1958_v19 = vrot.slane %v1944_v13, %v3308_v51  ;;  %v1973_v20 = vrot.slane %v1959_v57, %v3308_v51  ;;  %v1974_v21 = vcombine.low %v1951_v14, %v1966_v15  ;;  %v1975_v22 = vcombine.high %v1951_v14, %v1966_v15  ;;  %v2728_v23 = vpop.f32.mrb[7].mxu1  ;;  %v2734_v26 = vpop.f32.mrb[11].mxu0 }
 0x878   : > { %v2010_v27 = vcombine.high %v1896_v17, %v2974_v34  ;;  %v2017_v28 = vrot.slane %v1896_v17, %v3308_v51  ;;  %v2025_v29 = vcombine.high %v1940_v18, %v2974_v34  ;;  %v2032_v30 = vrot.slane %v1940_v18, %v3308_v51 }
 0x879   : > { %v1982_v31 = vrot.slane %v1974_v21, %v3312_v55  ;;  %v1989_v32 = vrot.slane %v1975_v22, %v3312_v55  ;;  %v1990_v33 = vcombine.low %v1958_v19, %v1973_v20  ;;  %v1991_v39 = vcombine.high %v1958_v19, %v1973_v20 }
 0x87a   : > { %v2024_v40 = vrot.slane %v2010_v27, %v3308_v51  ;;  %v2039_v43 = vrot.slane %v2025_v29, %v3308_v51  ;;  %v2040_v46 = vcombine.low %v2017_v28, %v2032_v30  ;;  %v2041_v47 = vcombine.high %v2017_v28, %v2032_v30 }
 0x87b   : > { %v1998_v48 = vrot.slane %v1990_v33, %v3312_v55  ;;  %v2005_v49 = vrot.slane %v1991_v39, %v3312_v55  ;;  %v2076_v50 = vcombine.low %v1982_v31, %v1989_v32  ;;  %v2656_v52 = vcombine.high %v1982_v31, %v1989_v32 }
 0x87c   : > { %v2048_v53 = vrot.slane %v2040_v46, %v3312_v55  ;;  %v2055_v54 = vrot.slane %v2041_v47, %v3312_v55  ;;  %v2056_v56 = vcombine.low %v2024_v40, %v2039_v43  ;;  %v2057_v59 = vcombine.high %v2024_v40, %v2039_v43 }
 0x87d   : > { %v2083_v60 = vrot.slane %v2076_v50, %v3308_v51  ;;  %v2091_v61 = vrot.slane %v2656_v52, %v3308_v51  ;;  %v2092_v36 = vcombine.low %v1998_v48, %v2005_v49  ;;  %v2657_v38 = vcombine.high %v1998_v48, %v2005_v49 }
 0x87e   : > { %v2064_v45 = vrot.slane %v2056_v56, %v3312_v55  ;;  %v2071_v42 = vrot.slane %v2057_v59, %v3312_v55  ;;  %v2126_v62 = vcombine.low %v2048_v53, %v2055_v54  ;;  %v2658_v63 = vcombine.high %v2048_v53, %v2055_v54  ;;  %v2297_v53 = vld [vmem:[%s3206_s8] sm:$0xff]  ;;  %v2298_v54 = vld [vmem:[%s3206_s8 + $0x8] sm:$0xff]  ;;  %v2299_v59 = vld [vmem:[%s3206_s8 + $0x10] sm:$0xff] }
 0x87f   : > { %v2099_v2 = vrot.slane %v2092_v36, %v3308_v51  ;;  %v2107_v3 = vrot.slane %v2657_v38, %v3308_v51  ;;  %v2108_v4 = vcombine.low %v2083_v60, %v2091_v61  ;;  %v2302_v56 = vpack.c.bf16 %v2298_v54, %v2297_v53  ;;  %v2300_v60 = vld [vmem:[%s3206_s8 + $0x18] sm:$0xff]  ;;  %s3702_s8 = sld [smem:[#allocation27_spill]] }
 0x880   : > { %v2133_v35 = vrot.slane %v2126_v62, %v3308_v51  ;;  %v2141_v37 = vrot.slane %v2658_v63, %v3308_v51  ;;  %v2142_v41 = vcombine.low %v2064_v45, %v2071_v42  ;;  %v2659_v44 = vcombine.high %v2064_v45, %v2071_v42 }
 0x881   : > { %v2116_v6 = vcombine.low %v2099_v2, %v2107_v3  ;;  %v2115_v10 = vrot.slane %v2108_v4, %v3312_v55  ;;  %2748 = vmatpush3.bf16.msra.mxu0 %v2302_v56  ;;  %v2303_v61 = vpack.c.bf16 %v2300_v60, %v2299_v59 }
 0x882   : > { %v2149_v7 = vrot.slane %v2142_v41, %v3308_v51  ;;  %v2157_v8 = vrot.slane %v2659_v44, %v3308_v51  ;;  %v2158_v9 = vcombine.low %v2133_v35, %v2141_v37  ;;  %2749 = vmatprep.subr.bf16.mxu0 %v2974_v34  ;;  %v2662_v34 = vld [vmem:[%s3695_s0] ss:$0 sm:$0xff] }
 0x883   : > { %v2123_v11 = vrot.slane %v2116_v6, %v3312_v55  ;;  %v2664_v6 = vld [vmem:[%s747_s21] ss:$0 sm:$0xff]  ;;  %s2404_s21 = scalar_select %p2359_p1, 1, 0 }
 0x884   : > { %v2166_v12 = vcombine.low %v2149_v7, %v2157_v8  ;;  %v2165_v57 = vrot.slane %v2158_v9, %v3312_v55 }
 0x885   : > { %v2124_v13 = vcombine.low %v2115_v10, %v2123_v11  ;;  %v2125_v14 = vcombine.high %v2115_v10, %v2123_v11  ;;  %2750 = vmatpush3.bf16.msra.mxu0 %v2303_v61  ;;  %s3562_s26 = scalar_lea.hbm %s3702_s8, %s2677_s28 }
 0x886   : > { %v2173_v15 = vrot.slane %v2166_v12, %v3312_v55  ;;  %v2660_v55 = vld [vmem:[%s733_s24] ss:$0 sm:$0xff]  ;;  %s2425_s24 = sshll.u32 %s3212_s16, 4  ;;  %s3564_s24 = int_to_ptr.vmem [resolvable:$true] %s2425_s24 }
 0x887   : > { %s2875_s6 = scalar_lea.vmem %s3564_s24, 256 }
 0x888   : > { %v2175_v58 = vcombine.high %v2165_v57, %v2173_v15  ;;  %v2174_v16 = vcombine.low %v2165_v57, %v2173_v15  ;;  %p2876_p2 = scmp.ne.s32.totalorder %s3564_s24, %s2875_s6 }
 0x88a   : > { %v2838_v17 = vpack.i.bf16 %v2175_v58, %v2125_v14  ;;  %p2877_p4 = pnand %p2876_p2, %p3123_p3 }
 0x88c   : > { %2839 = vrot.lane.b32.xlu1 %v2838_v17, %s2980_s17  ;;  %s3700_s17 = sld [smem:[#allocation7_spill]]  ;;  %p2878_p5 = pneg %p2877_p4 }
 0x892   : > { %s3703_s30 = sand.u32 1, %s3700_s17  }
 0x893   : > { %s3572_s23 = scalar_lea.sflag [#allocation4], %s3703_s30 }
 0x8fe   : > { %v2840_v18 = vpop.permute.xlu1 %2839 }
 0x8ff   : > { %v2842_v51 = vunpack.i.h.bf16 %v2840_v18  ;;  %v2841_v19 = vunpack.i.l.bf16 %v2840_v18 }
 0x901   : > { %v2184_v20 = vsel %vm822_vm3, %v2124_v13, %v2841_v19  ;;  %v2185_v21 = vsel %vm822_vm3, %v2174_v16, %v2842_v51 }
 0x902   : > { %v2194_v22 = vpack.c.bf16 %v2185_v21, %v2184_v20 }
 0x904   : > { %2744 = vmatmul.mubr.msk.bf16.vlgmr.msra.gmra.mrb[8].mxu1 %vm2206_vm6, %v2194_v22 }
 0x9d7   : > { %v2244_v23 = vpop.f32.mrb[8].mxu1 }
 0x9d8   : > { %v2245_v26 = vadd.f32 %v2660_v55, %v2244_v23  ;;  %v2745_v27 = vpop.f32.mrb[9].mxu1 }
 0x9d9   : > { %v2247_v28 = vpop.f32.mrb[10].mxu1 }
 0x9da   : > { %v2251_v29 = vadd.f32 %v2245_v26, %v3247_v24  ;;  %v2248_v30 = vadd.f32 %v2660_v55, %v2247_v28  ;;  %v2746_v31 = vpop.f32.mrb[11].mxu1 }
 0x9dc   : > { %v2252_v32 = vadd.f32 %v2248_v30, %v3249_v25  ;;  %v2255_v33 = vsel %vm822_vm3, %v2251_v29, 0.0 }
 0x9dd   : > { %2256 = vadd.xlane.f32.xlu1 %v2255_v33 }
 0x9de   : > { %v2258_v39 = vsel %vm822_vm3, %v2252_v32, 0.0 }
 0x9df   : > { %2259 = vadd.xlane.f32.xlu0 %v2258_v39  ;;  %v2405_v39 = vstv %s2404_s21  ;;  %s2879_s21 = sshll.u32 %s2981_s22, 4  ;;  %s2880_s21 = int_to_ptr.vmem [resolvable:$false] %s2879_s21 }
 0x9e0   : > { %vm2406_vm7 = vcmp.eq.s32.totalorder %v2405_v39, 1  ;;  %s2881_s29 = scalar_lea.vmem %s2880_s21, 512  ;;  %p2882_p6 = scmp.lt.s32.totalorder %s3564_s24, %s2880_s21 }
 0x9e1   : > { %p2883_p7 = scmp.lt.s32.totalorder %s2881_s29, %s2875_s6 }
 0x9e3   : > { %p2884_p8 = por %p2883_p7, %p2882_p6 }
 0x9e5   : > { %p2885_p10 = pnand %p2884_p8, %p2878_p5 }
 0xa6a   : > { %v2257_v40 = vpop.xlane.xlu1 %2256 }
 0xa6b   : > { %v2261_v43 = vmul.f32 0.03125, %v2257_v40 }
 0xa6c   : > { %v2260_v46 = vpop.xlane.xlu0 %2259 }
 0xa6d   : > { %v2263_v47 = vsub.f32 %v2251_v29, %v2261_v43  ;;  %v2262_v48 = vmul.f32 0.03125, %v2260_v46  ;;  %v2667_v43 = vld [vmem:[%s3699_s27] ss:$0 sm:$0xff] }
 0xa6f   : > { %v2264_v24 = vsub.f32 %v2252_v32, %v2262_v48  ;;  %v2265_v49 = vmul.f32 %v2263_v47, %v2263_v47 }
 0xa71   : > { %v2267_v50 = vsel %vm822_vm3, %v2265_v49, 0.0  ;;  %v2266_v25 = vmul.f32 %v2264_v24, %v2264_v24 }
 0xa72   : > { %2268 = vadd.xlane.f32.xlu0 %v2267_v50 }
 0xa73   : > { %v2270_v52 = vsel %vm822_vm3, %v2266_v25, 0.0 }
 0xa76   : > { %2271 = vadd.xlane.f32.xlu0 %v2270_v52 }
 0xaff   : > { %v2269_v36 = vpop.xlane.xlu0 %2268 }
 0xb00   : > { %v2273_v38 = vmul.f32 0.03125, %v2269_v36 }
 0xb02   : > { %v2275_v45 = vadd.f32 1e-05, %v2273_v38 }
 0xb03   : > { %v2272_v42 = vpop.xlane.xlu0 %2271 }
 0xb04   : > { %2867 = vrsqrt.f32 %v2275_v45  ;;  %v2274_v62 = vmul.f32 0.03125, %v2272_v42 }
 0xb06   : > { %v2276_v63 = vadd.f32 1e-05, %v2274_v62 }
 0xb08   : > { %2869 = vrsqrt.f32 %v2276_v63 }
 0xb0e   : > { %v2868_v0 = vpop.eup %2867 }
 0xb0f   : > { %v2279_v1 = vmul.f32 %v2868_v0, %v2263_v47 }
 0xb11   : > { %v2287_v3 = vmul.f32 %v2662_v34, %v2279_v1 }
 0xb12   : > { %v2870_v2 = vpop.eup %2869 }
 0xb13   : > { %v2280_v4 = vmul.f32 %v2870_v2, %v2264_v24  ;;  %v2295_v37 = vadd.f32 %v2663_v5, %v2287_v3 }
 0xb15   : > { %v2288_v35 = vmul.f32 %v2662_v34, %v2280_v4 }
 0xb17   : > { %v2296_v41 = vadd.f32 %v2663_v5, %v2288_v35 }
 0xb19   : > { %v2301_v44 = vpack.c.bf16 %v2296_v41, %v2295_v37 }
 0xb1b   : > { %2752 = vmatmul.mubr.msk.bf16.vlgmr.msra.gmra.mrb[12].mxu0 %vm822_vm3, %v2301_v44 }
 0xbee   : > { %v2348_v7 = vpop.f32.mrb[12].mxu0 }
 0xbef   : > { %v2349_v8 = vadd.f32 %v2664_v6, %v2348_v7  ;;  %v2753_v9 = vpop.f32.mrb[13].mxu0 }
 0xbf0   : > { %v2351_v10 = vpop.f32.mrb[14].mxu0 }
 0xbf1   : > { %v2355_v11 = vadd.f32 %v2349_v8, %v2251_v29  ;;  %v2352_v12 = vadd.f32 %v2664_v6, %v2351_v10  ;;  %v2754_v13 = vpop.f32.mrb[15].mxu0 }
 0xbf3   : > { %2357 = vst.msk [vmem:[#allocation2] sm:$0xff] %vm822_vm3, %v2355_v11  ;;  %v2356_v14 = vadd.f32 %v2352_v12, %v2252_v32  ;;  %v2362_v57 = vsel %vm822_vm3, %v2355_v11, 0.0  ;;  %v2666_v32 = vld [vmem:[%s3698_s20] ss:$0 sm:$0xff] }
 0xbf4   : > { %2363 = vadd.xlane.f32.xlu1 %v2362_v57 }
 0xbf5   : > { %2358 = vst.msk [vmem:[#allocation2 + $0x8] sm:$0xff] %vm822_vm3, %v2356_v14  ;;  %v2365_v15 = vsel %vm822_vm3, %v2356_v14, 0.0 }
 0xbf6   : > { %2366 = vadd.xlane.f32.xlu0 %v2365_v15 }
 0xc81   : > { %v2364_v58 = vpop.xlane.xlu1 %2363 }
 0xc82   : > { %v2368_v16 = vmul.f32 0.03125, %v2364_v58 }
 0xc83   : > { %v2367_v17 = vpop.xlane.xlu0 %2366 }
 0xc84   : > { %v2370_v18 = vsub.f32 %v2355_v11, %v2368_v16  ;;  %v2369_v51 = vmul.f32 0.03125, %v2367_v17 }
 0xc86   : > { %v2371_v19 = vsub.f32 %v2356_v14, %v2369_v51  ;;  %v2372_v20 = vmul.f32 %v2370_v18, %v2370_v18 }
 0xc88   : > { %v2374_v21 = vsel %vm822_vm3, %v2372_v20, 0.0  ;;  %v2373_v22 = vmul.f32 %v2371_v19, %v2371_v19 }
 0xc89   : > { %2375 = vadd.xlane.f32.xlu1 %v2374_v21 }
 0xc8a   : > { %v2377_v55 = vsel %vm822_vm3, %v2373_v22, 0.0 }
 0xc8b   : > { %2378 = vadd.xlane.f32.xlu0 %v2377_v55 }
 0xd16   : > { %v2376_v23 = vpop.xlane.xlu1 %2375 }
 0xd17   : > { %v2380_v26 = vmul.f32 0.03125, %v2376_v23 }
 0xd18   : > { %v2379_v27 = vpop.xlane.xlu0 %2378 }
 0xd19   : > { %v2382_v28 = vadd.f32 1e-05, %v2380_v26  ;;  %v2381_v29 = vmul.f32 0.03125, %v2379_v27 }
 0xd1b   : > { %2871 = vrsqrt.f32 %v2382_v28  ;;  %v2383_v30 = vadd.f32 1e-05, %v2381_v29 }
 0xd1d   : > { %2873 = vrsqrt.f32 %v2383_v30 }
 0xd25   : > { %v2872_v31 = vpop.eup %2871 }
 0xd26   : > { %v2386_v33 = vmul.f32 %v2872_v31, %v2370_v18 }
 0xd27   : > { %v2874_v40 = vpop.eup %2873 }
 0xd28   : > { %v2394_v46 = vmul.f32 %v2666_v32, %v2386_v33  ;;  %v2387_v47 = vmul.f32 %v2874_v40, %v2371_v19 }
 0xd2a   : > { %v2402_v48 = vadd.f32 %v2667_v43, %v2394_v46  ;;  %v2395_v24 = vmul.f32 %v2666_v32, %v2387_v47 }
 0xd2c   : > { %v2403_v49 = vadd.f32 %v2667_v43, %v2395_v24  ;;  %v2407_v50 = vsel %vm2406_vm7, %v2402_v48, %v2355_v11 }
 0xd2d   : > { %2409 = vst.msk [vmem:[%s3212_s16] sm:$0xff] %vm822_vm3, %v2407_v50 }
 0xd2e   : > { %v2408_v25 = vsel %vm2406_vm7, %v2403_v49, %v2356_v14 }
 0xd2f   : > { %2410 = vst.msk [vmem:[%s3212_s16 + $0x8] sm:$0xff] %vm822_vm3, %v2408_v25 }
 0xd30   : > { %2888 = shalt.err (!%p2885_p10)
}
 0xd31   : > { %s2889_s16 = scalar_lea.hbm %s3562_s26, 256  ;;  %s2893_s19 = scalar_lea.hbm %s3702_s8, 512 }
 0xd32   : > { %p2890_p11 = scmp.ne.s32.totalorder %s3562_s26, %s2889_s16  ;;  %p2894_p0 = scmp.lt.u32.totalorder %s3562_s26, %s3702_s8 }
 0xd33   : > { %p2895_p1 = scmp.lt.u32.totalorder %s2893_s19, %s2889_s16  ;;  %p2897_p4 = scmp.lt.u32.totalorder %s2889_s16, %s3562_s26 }
 0xd34   : > { %p2891_p12 = pnand %p2890_p11, %p3123_p3 }
 0xd35   : > { %p2896_p2 = por %p2895_p1, %p2894_p0 }
 0xd36   : > { %p2892_p13 = pneg %p2891_p12 }
 0xd37   : > { %p2898_p5 = por %p2897_p4, %p2896_p2 }
 0xd39   : > { %p2899_p6 = pnand %p2898_p5, %p2892_p13 }
 0xd3b   : > { %2902 = shalt.err (!%p2899_p6)
}
 0xd3c   : > { %s2982_s17 = smov 128   ;;  %s2983_s28 = smov 8  }
 0xd3d   : > { %2755 = dma.vmem_to_hbm [thread:$0]  (%p3123_p3), %s3564_s24, 256, %s3562_s26, %s3572_s23, %s2982_s17, %s2982_s17, %s2983_s28  }
 0xd3e PF: > { %s3704_s7 = sld [smem:[#allocation13_spill]]  ;;  %s3705_s0 = sld [smem:[#allocation6_spill]] }
 0xd44   : > { %p2761_p7 = scmp.ge.s32.totalorder %s3704_s7, 2  ;;  %s2440_s6 = sand.u32 1, %s3705_s0  }
 0xd45   : > { %s2441_s22 = scalar_lea.sflag [#allocation4], %s2440_s6 }
 0xd46   : > { %p2758_p8 = pnand %p2761_p7, %p3133_p9 }
 0xd48   : > { %2936 = dma.done.wait (!%p2758_p8), %s2441_s22, 256  }
 0xd49   : > { %2938 = vsyncadd (!%p2758_p8), %s2441_s22, 4294967040  ;;  %s30_s30 = sadd.s32 1, %s3704_s7   ;;  %s3707_s24 = sld [smem:[#allocation7_spill]] }
 0xd4a   : > { %p27_p10 = scmp.ge.s32.totalorder %s30_s30, 6   ;;  %s3708_s25 = sld [smem:[#allocation8_spill]] }
 0xd4b   : > { %s3709_s26 = sld [smem:[#allocation18_spill]]  ;;  %s3710_s27 = sld [smem:[#allocation11_spill]] }
 0xd4c   : > { %s3711_s28 = sld [smem:[#allocation12_spill]]  ;;  %s3712_s29 = sld [smem:[#allocation14_spill]] }
 0xd4d   : > { %s3713_s0 = sld [smem:[#allocation16_spill]]  ;;  %29 = sbr.rel (!%p27_p10) target bundleno = 15 (0xf), region = 163 }
 0xd54   :  { %2446 = vsyncpa [#allocation4], 1 }
 0xd55   :  { %2448 = vsyncpa [#allocation4 + $0x1], 1 }

</bundles_post_ra>
